<compile_context>
chip_gen: v7x
topology: tpu7x:2x2x1
jax: 0.10.0
libtpu: 0.0.40
codegen_flags: <defaults>
</compile_context>

<pallas_src>
import jax
import jax.numpy as jnp
from jax.experimental import pallas as pl
from jax.experimental.pallas import tpu as pltpu

LANES = 128                               # vreg lane width
_FLAT_BLOCK_COLS = 512                    # lane-dense width for the flatten fallback
_TARGET_TILE_BYTES = 8 * 1024 * 1024      # ~8 MiB per buffer
_VMEM_LIMIT_BYTES = 48 * 1024 * 1024      # 32 MiB double-buffered tiles + slack (< 64 MiB v7x)
_SMALL_INPUT_BYTES = 1 << 20              # below this, plain jnp.maximum wins


def _relu_kernel(x_ref, o_ref):
    # Whole-tile elementwise max on the VPU; lane-dense tile -> unmasked vst.
    o_ref[...] = jnp.maximum(x_ref[...], 0)


def _round_up(n, m):
    return ((n + m - 1) // m) * m


def _sublane_multiple(itemsize):
    # f32 -> 8, bf16 -> 16, int8/fp8 -> 32 (sub-32-bit dtypes pack along sublanes).
    return max(8, 32 // itemsize)


def _choose_tile_rows(rows, cols, itemsize):
    sub = _sublane_multiple(itemsize)
    if rows <= sub:
        # Single block covering the whole (short) slab; block dim == full array dim.
        return rows
    # Rows per ~8 MiB tile, rounded down to a sublane multiple.
    target = max(sub, (_TARGET_TILE_BYTES // (cols * itemsize)) // sub * sub)
    # Cap at ~rows/2 so the "parallel" grid axis has >= 2 steps (v7x: 2 TCs).
    half = _round_up(pl.cdiv(rows, 2), sub)
    return max(sub, min(target, half))


def _relu_2d(slab, tile_rows):
    rows, cols = slab.shape
    grid = (pl.cdiv(rows, tile_rows),)
    return pl.pallas_call(
        _relu_kernel,
        out_shape=jax.ShapeDtypeStruct((rows, cols), slab.dtype),
        grid_spec=pltpu.PrefetchScalarGridSpec(
            num_scalar_prefetch=0,
            grid=grid,
            in_specs=[pl.BlockSpec((tile_rows, cols), lambda i: (i, 0))],
            out_specs=pl.BlockSpec((tile_rows, cols), lambda i: (i, 0)),
        ),
        compiler_params=pltpu.CompilerParams(
            dimension_semantics=("parallel",),       # megacore / 2-TC sharding
            vmem_limit_bytes=_VMEM_LIMIT_BYTES,
        ),
    )(slab)


def rectified_linear(x):
    """Forward pass of RectifiedLinear (i.e. ReLU) as a Pallas TPU kernel."""
    orig_shape = x.shape
    n = x.size
    if n == 0:
        return x
    itemsize = jnp.dtype(x.dtype).itemsize

    # Tiny activations (typical FSMN-VAD streaming shapes): skip the kernel.
    if n * itemsize < _SMALL_INPUT_BYTES:
        return jnp.maximum(x, 0)

    sub = _sublane_multiple(itemsize)
    cols = orig_shape[-1]
    if cols % LANES == 0 and sub * cols * itemsize <= _TARGET_TILE_BYTES:
        # Already lane-dense: tile the original array directly.  No pad, no
        # slice-back -> no extra HBM passes.  Ragged last row-block is handled
        # by Pallas (OOB output rows are never written back; elementwise-safe).
        slab = x.reshape(-1, cols)
        tile_rows = _choose_tile_rows(slab.shape[0], cols, itemsize)
        return _relu_2d(slab, tile_rows).reshape(orig_shape)

    # Fallback for non-128-multiple feature dims: flatten to a lane-dense
    # (rows, 512) slab.  Only the sub-512-element flat tail is zero-padded
    # (ReLU(0) == 0 -> safe); the row remainder stays a ragged last block.
    flat = x.reshape(-1)
    padded_n = _round_up(n, _FLAT_BLOCK_COLS)
    if padded_n != n:
        flat = jnp.pad(flat, (0, padded_n - n))
    rows = padded_n // _FLAT_BLOCK_COLS
    slab = flat.reshape(rows, _FLAT_BLOCK_COLS)
    tile_rows = _choose_tile_rows(rows, _FLAT_BLOCK_COLS, itemsize)
    out = _relu_2d(slab, tile_rows).reshape(-1)
    if padded_n != n:
        out = out[:n]
    return out.reshape(orig_shape)


if __name__ == "__main__":
    key = jax.random.PRNGKey(0)
    k1, k2, k3, k4 = jax.random.split(key, 4)

    # 1) Small activation shapes consistent with FSMN-VAD streaming usage
    #    (batch, time, feature) -> jnp fast path.
    x_small = jax.random.normal(k1, (2, 16, 64), dtype=jnp.float32)
    y_small = jax.block_until_ready(rectified_linear(x_small))
    assert y_small.shape == x_small.shape
    assert jnp.array_equal(y_small, jnp.maximum(x_small, 0.0)), "fast-path mismatch"

    x_ragged_small = jax.random.normal(k2, (3, 7, 5), dtype=jnp.float32)
    y_ragged_small = jax.block_until_ready(rectified_linear(x_ragged_small))
    assert jnp.array_equal(y_ragged_small, jnp.maximum(x_ragged_small, 0.0)), "fast-path mismatch"

    # 2) Lane-dense input large enough to exercise the Pallas kernel
    #    (direct path, no pad/slice, 2 grid steps).
    x_pallas = jax.random.normal(k3, (4, 512, 512), dtype=jnp.float32)
    y_pallas = jax.block_until_ready(rectified_linear(x_pallas))
    assert y_pallas.shape == x_pallas.shape
    assert jnp.array_equal(y_pallas, jnp.maximum(x_pallas, 0.0)), "pallas direct-path mismatch"

    # 2b) Same shape in bf16 to exercise dtype-aware sublane tiling.
    x_bf16 = x_pallas.astype(jnp.bfloat16)
    y_bf16 = jax.block_until_ready(rectified_linear(x_bf16))
    assert jnp.array_equal(y_bf16, jnp.maximum(x_bf16, 0)), "pallas bf16 mismatch"

    # 3) Non-128-multiple feature dim, large enough for the flatten fallback
    #    (tail pad + ragged last row-block).
    x_fallback = jax.random.normal(k4, (3, 1000, 250), dtype=jnp.float32)
    y_fallback = jax.block_until_ready(rectified_linear(x_fallback))
    assert y_fallback.shape == x_fallback.shape
    assert jnp.array_equal(y_fallback, jnp.maximum(x_fallback, 0.0)), "pallas fallback mismatch"

    print("KERNEL_OK")
</pallas_src>

<mosaic_0001>
module attributes {stable_mosaic.version = 11 : i64} {
  func.func @_relu_kernel(%arg0: i32, %arg1: memref<1024x512xf32, #tpu.memory_space<vmem>>, %arg2: memref<1024x512xf32, #tpu.memory_space<vmem>>) attributes {dimension_semantics = [#tpu.dimension_semantics<parallel>], iteration_bounds = array<i64: 2>, scalar_prefetch = 0 : i64, scratch_operands = 0 : i64, tpu.core_type = #tpu.core_type<tc>, window_params = [{transform_indices = @transform_0, window_bounds = array<i64: 1024, 512>}, {transform_indices = @transform_1, window_bounds = array<i64: 1024, 512>}]} {
    %c0 = arith.constant 0 : index
    %c0_0 = arith.constant 0 : index
    %0 = vector.load %arg1[%c0, %c0_0] : memref<1024x512xf32, #tpu.memory_space<vmem>>, vector<1024x512xf32>
    %cst = arith.constant 0.000000e+00 : f32
    %1 = vector.broadcast %cst : f32 to vector<1024x512xf32>
    %2 = arith.maximumf %0, %1 : vector<1024x512xf32>
    %c0_1 = arith.constant 0 : index
    %c0_2 = arith.constant 0 : index
    %3 = vector.load %arg2[%c0_1, %c0_2] : memref<1024x512xf32, #tpu.memory_space<vmem>>, vector<1024x512xf32>
    tpu.vector_store %arg2[%c0_1, %c0_2], %2 {strides = array<i32>} : memref<1024x512xf32, #tpu.memory_space<vmem>>, vector<1024x512xf32>,
    return
  }
  func.func @transform_0(%arg0: i32) -> (i32, i32) {
    %c0_i32 = arith.constant 0 : i32
    %c0_i32_0 = arith.constant 0 : i32
    return %arg0, %c0_i32 : i32, i32
  }
  func.func @transform_1(%arg0: i32) -> (i32, i32) {
    %c0_i32 = arith.constant 0 : i32
    %c0_i32_0 = arith.constant 0 : i32
    return %arg0, %c0_i32 : i32, i32
  }
}

</mosaic_0001>

<bundles_post_ra>
// kernel: tpu_custom_call.1
= control target key start
LH: loop header
LB: loop body
LE: loop exit
PB: predicated region body
PF: predicated region fallthrough
CT: control target
= control target key end

     0   :  { %6 = vsyncpa [#allocation3], 0  ;;  %s3137_s0 = inlined_call_operand.hbm [shape: f32[2048,512], index: 0, kind: input, shape index: {}]   ;;  %s3138_s1 = inlined_call_operand.hbm [shape: f32[2048,512], index: 1, kind: output, shape index: {}]  }
   0x1   :  { %8 = vsyncpa [#allocation3 + $0x1], 0 }
   0x2   :  { %9 = vsyncpa [#allocation4], 0 }
   0x3   :  { %11 = vsyncpa [#allocation4 + $0x1], 0  ;;  %s1946_s6 = smov 0   ;;  %s1948_s7 = smov 0  }
   0x4   :  { %s1950_s8 = smov 0   ;;  %s1952_s9 = smov 0  }
   0x5 LB: > { %s1967_s10 = sadd.s32 4294967295, %s1928_s9   ;;  %s1762_s11 = sadd.s32 4294967294, %s1928_s9   ;;  %s1928_s9 = sphi %s1952_s9, %s3151_s9   ;;  %s1924_s8 = sphi %s1950_s8, %s3150_s8   ;;  %s1920_s7 = sphi %s1948_s7, %s3149_s7   ;;  %s1916_s6 = sphi %s1946_s6, %s3148_s6  }
   0x6   : > { %s1971_s12 = sadd.s32 1, %s1928_s9   ;;  %s24_s13 = sadd.s32 1, %s1924_s8 }
   0x7   : > { %s21_s14 = ssub.s32 %s1928_s9, %s1971_s12  ;;  %p31_p0 = scmp.ne.s32.totalorder %s1924_s8, %s1920_s7 }
   0x8   : > { %p22_p1 = scmp.eq.s32.totalorder %s21_s14, 0  ;;  %p32_p2 = scmp.eq.s32.totalorder %s1928_s9, 0 }
   0x9   : > { %p37_p3 = scmp.ne.s32.totalorder %s1920_s7, %s1916_s6  ;;  %p38_p4 = scmp.eq.s32.totalorder %s1967_s10, 0 }
   0xa   : > { %s1983_s15 = scalar_select %p22_p1, %s1924_s8, %s24_s13  }
   0xb   : > { %p1985_p5 = por %p32_p2, %p31_p0  ;;  %p1989_p6 = por %p38_p4, %p37_p3 }
   0xc   : > { %p61_p7 = scmp.eq.s32.totalorder %s1967_s10, 1  ;;  %p67_p8 = scmp.eq.s32.totalorder %s1762_s11, 1 }
   0xd   : > { %p1794_p10 = scmp.lt.s32.totalorder %s1928_s9, 2  ;;  %s87_s20 = sand.u32 1, %s1924_s8  }
   0xe   : > { %p1996_p11 = por %p61_p7, %p31_p0  ;;  %p2000_p12 = por %p67_p8, %p37_p3 }
   0xf   : > { %s1779_s21 = sshll.u32 %s1928_s9, 16  ;;  %s1765_s22 = sshll.u32 %s87_s20, 12 }
  0x10   : > { %s3142_s18 = scalar_select %p1996_p11, 1, 0 }
  0x11   : > { %s3143_s19 = scalar_select %p2000_p12, 1, 0 }
  0x12   : > { %s2009_s25 = scalar_lea.hbm %s3137_s0, %s1779_s21  ;;  %s91_s26 = scalar_lea.vmem [#allocation2], %s1765_s22 }
  0x13   : > { %s99_s27 = sshll.u32 %s91_s26, 4  ;;  %p2013_p13 = pnand %p1794_p10, %p1985_p5  ;;  %s2017_s27 = int_to_ptr.vmem [resolvable:$true] %s99_s27 }
  0x14   : > { %s2019_s29 = scalar_lea.sflag [#allocation3], %s87_s20  ;;  %s1832_s30 = scalar_lea.hbm %s2009_s25, 65536 }
  0x15   : > { %p1833_p0 = scmp.ne.s32.totalorder %s2009_s25, %s1832_s30  ;;  %p1834_p1 = pneg %p2013_p13 }
  0x16   : > { %s1837_s4 = scalar_lea.hbm %s3137_s0, 131072  ;;  %p1838_p4 = scmp.lt.u32.totalorder %s2009_s25, %s3137_s0 }
  0x17   : > { %p1835_p2 = pnand %p1834_p1, %p1833_p0  ;;  %p1839_p5 = scmp.lt.u32.totalorder %s1837_s4, %s1832_s30 }
  0x18   : > { %p1841_p8 = scmp.lt.u32.totalorder %s1832_s30, %s2009_s25 }
  0x19   : > { %p1836_p3 = pneg %p1835_p2  ;;  %p1840_p7 = por %p1839_p5, %p1838_p4 }
  0x1b   : > { %p1842_p10 = por %p1841_p8, %p1840_p7 }
  0x1d   : > { %p1843_p9 = pnand %p1842_p10, %p1836_p3 }
  0x1f   : > { %1846 = shalt.err (!%p1843_p9)
}
  0x20   : > { %s1847_s13 = scalar_lea.vmem %s2017_s27, 65536  ;;  %s1930_s14 = smov [#allocation2]  }
  0x21   : > { %p1848_p0 = scmp.ne.s32.totalorder %s2017_s27, %s1847_s13  ;;  %s1852_s16 = sshll.u32 %s1930_s14, 4  ;;  %s1853_s16 = int_to_ptr.vmem [resolvable:$false] %s1852_s16 }
  0x22   : > { %s1854_s20 = scalar_lea.vmem %s1853_s16, 131072  ;;  %p1855_p11 = scmp.lt.s32.totalorder %s2017_s27, %s1853_s16 }
  0x23   : > { %p1850_p2 = pnand %p1848_p0, %p1834_p1  ;;  %p1856_p4 = scmp.lt.s32.totalorder %s1854_s20, %s1847_s13 }
  0x25   : > { %p1851_p12 = pneg %p1850_p2  ;;  %p1857_p5 = por %p1856_p4, %p1855_p11 }
  0x27   : > { %p1858_p7 = pnand %p1857_p5, %p1851_p12 }
  0x29   : > { %1861 = shalt.err (!%p1858_p7)
}
  0x2a   : > { %s1931_s21 = smov 512   ;;  %s1932_s22 = smov 32  }
  0x2b   : > { %1789 = dma.hbm_to_vmem [thread:$0]  (!%p2013_p13), %s2009_s25, 65536, %s2017_s27, %s2019_s29, %s1931_s21, %s1931_s21, %s1932_s22  }
  0x2c   : > { %p1769_p9 = scmp.ge.s32.totalorder %s1928_s9, 1  ;;  %p107_p1 = scmp.lt.s32.totalorder %s1928_s9, 3 }
  0x2e   : > { %p108_p3 = pnand %p1769_p9, %p107_p1 }
  0x2f   : > { %s2050_s23 = sand.u32 (!%p108_p3), 1, %s1920_s7  }
  0x30   : > { %111 = sbr.rel (%p108_p3) target bundleno = 336 (0x150), region = 24  ;;  %s1770_s24 = sshll.u32 (!%p108_p3), %s2050_s23, 12 }
  0x31   : > { %s114_s26 = scalar_lea.sflag (!%p108_p3), [#allocation3], %s2050_s23  ;;  %s2054_s30 = scalar_lea.vmem (!%p108_p3), [#allocation2], %s1770_s24 }
  0x37   : > { %1907 = dma.done.wait (%p1989_p6), %s114_s26, 65536  }
  0x38   : > { %1909 = vsyncadd (%p1989_p6), %s114_s26, 4294901760  ;;  %v138_v0 = vld [vmem:[%s2054_s30] sm:$0xff]  ;;  %v139_v1 = vld [vmem:[%s2054_s30 + $0x8] sm:$0xff]  ;;  %s2069_s17 = scalar_lea.vmem [#allocation5], %s1770_s24  ;;  %s1781_s25 = sshll.u32 %s1967_s10, 16 }
  0x39   : > { %v140_v2 = vld [vmem:[%s2054_s30 + $0x10] sm:$0xff]  ;;  %v650_v3 = vmax.f32 %v138_v0, 0.0  ;;  %v651_v4 = vmax.f32 %v139_v1, 0.0  ;;  %v141_v6 = vld [vmem:[%s2054_s30 + $0x18] sm:$0xff]  ;;  %v142_v7 = vld [vmem:[%s2054_s30 + $0x20] sm:$0xff]  ;;  %s1689_s27 = sshll.u32 %s2069_s17, 4  ;;  %s3089_s2 = scalar_lea.hbm %s3138_s1, %s1781_s25  ;;  %s3091_s27 = int_to_ptr.vmem [resolvable:$true] %s1689_s27 }
  0x3a   : > { %v652_v5 = vmax.f32 %v140_v2, 0.0  ;;  %v143_v8 = vld [vmem:[%s2054_s30 + $0x28] sm:$0xff]  ;;  %v653_v9 = vmax.f32 %v141_v6, 0.0  ;;  %v654_v10 = vmax.f32 %v142_v7, 0.0  ;;  %v144_v12 = vld [vmem:[%s2054_s30 + $0x30] sm:$0xff]  ;;  %v145_v13 = vld [vmem:[%s2054_s30 + $0x38] sm:$0xff] }
  0x3b   : > { %v655_v11 = vmax.f32 %v143_v8, 0.0  ;;  %v146_v14 = vld [vmem:[%s2054_s30 + $0x40] sm:$0xff]  ;;  %1162 = vst [vmem:[%s2069_s17] sm:$0xff] %v650_v3  ;;  %1163 = vst [vmem:[%s2069_s17 + $0x8] sm:$0xff] %v651_v4  ;;  %v656_v15 = vmax.f32 %v144_v12, 0.0  ;;  %v657_v16 = vmax.f32 %v145_v13, 0.0  ;;  %v147_v18 = vld [vmem:[%s2054_s30 + $0x48] sm:$0xff] }
  0x3c   : > { %1164 = vst [vmem:[%s2069_s17 + $0x10] sm:$0xff] %v652_v5  ;;  %v658_v17 = vmax.f32 %v146_v14, 0.0  ;;  %v148_v19 = vld [vmem:[%s2054_s30 + $0x50] sm:$0xff]  ;;  %v149_v20 = vld [vmem:[%s2054_s30 + $0x58] sm:$0xff]  ;;  %1165 = vst [vmem:[%s2069_s17 + $0x18] sm:$0xff] %v653_v9  ;;  %v659_v21 = vmax.f32 %v147_v18, 0.0 }
  0x3d   : > { %1166 = vst [vmem:[%s2069_s17 + $0x20] sm:$0xff] %v654_v10  ;;  %1167 = vst [vmem:[%s2069_s17 + $0x28] sm:$0xff] %v655_v11  ;;  %v660_v22 = vmax.f32 %v148_v19, 0.0  ;;  %v661_v23 = vmax.f32 %v149_v20, 0.0  ;;  %v150_v24 = vld [vmem:[%s2054_s30 + $0x60] sm:$0xff]  ;;  %v151_v25 = vld [vmem:[%s2054_s30 + $0x68] sm:$0xff] }
  0x3e   : > { %v152_v26 = vld [vmem:[%s2054_s30 + $0x70] sm:$0xff]  ;;  %1168 = vst [vmem:[%s2069_s17 + $0x30] sm:$0xff] %v656_v15  ;;  %1169 = vst [vmem:[%s2069_s17 + $0x38] sm:$0xff] %v657_v16  ;;  %v662_v27 = vmax.f32 %v150_v24, 0.0  ;;  %v663_v28 = vmax.f32 %v151_v25, 0.0  ;;  %v153_v30 = vld [vmem:[%s2054_s30 + $0x78] sm:$0xff] }
  0x3f   : > { %1170 = vst [vmem:[%s2069_s17 + $0x40] sm:$0xff] %v658_v17  ;;  %v664_v29 = vmax.f32 %v152_v26, 0.0  ;;  %v154_v31 = vld [vmem:[%s2054_s30 + $0x80] sm:$0xff]  ;;  %v155_v32 = vld [vmem:[%s2054_s30 + $0x88] sm:$0xff]  ;;  %1171 = vst [vmem:[%s2069_s17 + $0x48] sm:$0xff] %v659_v21  ;;  %v665_v33 = vmax.f32 %v153_v30, 0.0 }
  0x40   : > { %1172 = vst [vmem:[%s2069_s17 + $0x50] sm:$0xff] %v660_v22  ;;  %1173 = vst [vmem:[%s2069_s17 + $0x58] sm:$0xff] %v661_v23  ;;  %v666_v34 = vmax.f32 %v154_v31, 0.0  ;;  %v667_v35 = vmax.f32 %v155_v32, 0.0  ;;  %v156_v36 = vld [vmem:[%s2054_s30 + $0x90] sm:$0xff]  ;;  %v157_v37 = vld [vmem:[%s2054_s30 + $0x98] sm:$0xff] }
  0x41   : > { %v158_v38 = vld [vmem:[%s2054_s30 + $0xa0] sm:$0xff]  ;;  %1174 = vst [vmem:[%s2069_s17 + $0x60] sm:$0xff] %v662_v27  ;;  %1175 = vst [vmem:[%s2069_s17 + $0x68] sm:$0xff] %v663_v28  ;;  %v668_v39 = vmax.f32 %v156_v36, 0.0  ;;  %v669_v40 = vmax.f32 %v157_v37, 0.0  ;;  %v159_v42 = vld [vmem:[%s2054_s30 + $0xa8] sm:$0xff] }
  0x42   : > { %1176 = vst [vmem:[%s2069_s17 + $0x70] sm:$0xff] %v664_v29  ;;  %v670_v41 = vmax.f32 %v158_v38, 0.0  ;;  %v160_v43 = vld [vmem:[%s2054_s30 + $0xb0] sm:$0xff]  ;;  %v161_v44 = vld [vmem:[%s2054_s30 + $0xb8] sm:$0xff]  ;;  %1177 = vst [vmem:[%s2069_s17 + $0x78] sm:$0xff] %v665_v33  ;;  %v671_v45 = vmax.f32 %v159_v42, 0.0 }
  0x43   : > { %1178 = vst [vmem:[%s2069_s17 + $0x80] sm:$0xff] %v666_v34  ;;  %1179 = vst [vmem:[%s2069_s17 + $0x88] sm:$0xff] %v667_v35  ;;  %v672_v46 = vmax.f32 %v160_v43, 0.0  ;;  %v673_v47 = vmax.f32 %v161_v44, 0.0  ;;  %v162_v48 = vld [vmem:[%s2054_s30 + $0xc0] sm:$0xff]  ;;  %v163_v49 = vld [vmem:[%s2054_s30 + $0xc8] sm:$0xff] }
  0x44   : > { %v164_v50 = vld [vmem:[%s2054_s30 + $0xd0] sm:$0xff]  ;;  %1180 = vst [vmem:[%s2069_s17 + $0x90] sm:$0xff] %v668_v39  ;;  %1181 = vst [vmem:[%s2069_s17 + $0x98] sm:$0xff] %v669_v40  ;;  %v674_v51 = vmax.f32 %v162_v48, 0.0  ;;  %v675_v52 = vmax.f32 %v163_v49, 0.0  ;;  %v165_v54 = vld [vmem:[%s2054_s30 + $0xd8] sm:$0xff] }
  0x45   : > { %1182 = vst [vmem:[%s2069_s17 + $0xa0] sm:$0xff] %v670_v41  ;;  %v676_v53 = vmax.f32 %v164_v50, 0.0  ;;  %v166_v55 = vld [vmem:[%s2054_s30 + $0xe0] sm:$0xff]  ;;  %v167_v56 = vld [vmem:[%s2054_s30 + $0xe8] sm:$0xff]  ;;  %1183 = vst [vmem:[%s2069_s17 + $0xa8] sm:$0xff] %v671_v45  ;;  %v677_v57 = vmax.f32 %v165_v54, 0.0 }
  0x46   : > { %1184 = vst [vmem:[%s2069_s17 + $0xb0] sm:$0xff] %v672_v46  ;;  %1185 = vst [vmem:[%s2069_s17 + $0xb8] sm:$0xff] %v673_v47  ;;  %v678_v58 = vmax.f32 %v166_v55, 0.0  ;;  %v679_v59 = vmax.f32 %v167_v56, 0.0  ;;  %v168_v60 = vld [vmem:[%s2054_s30 + $0xf0] sm:$0xff]  ;;  %v169_v61 = vld [vmem:[%s2054_s30 + $0xf8] sm:$0xff] }
  0x47   : > { %v170_v62 = vld [vmem:[%s2054_s30 + $0x100] sm:$0xff]  ;;  %1186 = vst [vmem:[%s2069_s17 + $0xc0] sm:$0xff] %v674_v51  ;;  %1187 = vst [vmem:[%s2069_s17 + $0xc8] sm:$0xff] %v675_v52  ;;  %v680_v63 = vmax.f32 %v168_v60, 0.0  ;;  %v681_v0 = vmax.f32 %v169_v61, 0.0  ;;  %v171_v2 = vld [vmem:[%s2054_s30 + $0x108] sm:$0xff] }
  0x48   : > { %1188 = vst [vmem:[%s2069_s17 + $0xd0] sm:$0xff] %v676_v53  ;;  %v682_v1 = vmax.f32 %v170_v62, 0.0  ;;  %v172_v3 = vld [vmem:[%s2054_s30 + $0x110] sm:$0xff]  ;;  %v173_v4 = vld [vmem:[%s2054_s30 + $0x118] sm:$0xff]  ;;  %1189 = vst [vmem:[%s2069_s17 + $0xd8] sm:$0xff] %v677_v57  ;;  %v683_v5 = vmax.f32 %v171_v2, 0.0 }
  0x49   : > { %1190 = vst [vmem:[%s2069_s17 + $0xe0] sm:$0xff] %v678_v58  ;;  %1191 = vst [vmem:[%s2069_s17 + $0xe8] sm:$0xff] %v679_v59  ;;  %v684_v6 = vmax.f32 %v172_v3, 0.0  ;;  %v685_v7 = vmax.f32 %v173_v4, 0.0  ;;  %v174_v8 = vld [vmem:[%s2054_s30 + $0x120] sm:$0xff]  ;;  %v175_v9 = vld [vmem:[%s2054_s30 + $0x128] sm:$0xff] }
  0x4a   : > { %v176_v10 = vld [vmem:[%s2054_s30 + $0x130] sm:$0xff]  ;;  %1192 = vst [vmem:[%s2069_s17 + $0xf0] sm:$0xff] %v680_v63  ;;  %1193 = vst [vmem:[%s2069_s17 + $0xf8] sm:$0xff] %v681_v0  ;;  %v686_v11 = vmax.f32 %v174_v8, 0.0  ;;  %v687_v12 = vmax.f32 %v175_v9, 0.0  ;;  %v177_v14 = vld [vmem:[%s2054_s30 + $0x138] sm:$0xff] }
  0x4b   : > { %1194 = vst [vmem:[%s2069_s17 + $0x100] sm:$0xff] %v682_v1  ;;  %v688_v13 = vmax.f32 %v176_v10, 0.0  ;;  %v178_v15 = vld [vmem:[%s2054_s30 + $0x140] sm:$0xff]  ;;  %v179_v16 = vld [vmem:[%s2054_s30 + $0x148] sm:$0xff]  ;;  %1195 = vst [vmem:[%s2069_s17 + $0x108] sm:$0xff] %v683_v5  ;;  %v689_v17 = vmax.f32 %v177_v14, 0.0 }
  0x4c   : > { %1196 = vst [vmem:[%s2069_s17 + $0x110] sm:$0xff] %v684_v6  ;;  %1197 = vst [vmem:[%s2069_s17 + $0x118] sm:$0xff] %v685_v7  ;;  %v690_v18 = vmax.f32 %v178_v15, 0.0  ;;  %v691_v19 = vmax.f32 %v179_v16, 0.0  ;;  %v180_v20 = vld [vmem:[%s2054_s30 + $0x150] sm:$0xff]  ;;  %v181_v21 = vld [vmem:[%s2054_s30 + $0x158] sm:$0xff] }
  0x4d   : > { %v182_v22 = vld [vmem:[%s2054_s30 + $0x160] sm:$0xff]  ;;  %1198 = vst [vmem:[%s2069_s17 + $0x120] sm:$0xff] %v686_v11  ;;  %1199 = vst [vmem:[%s2069_s17 + $0x128] sm:$0xff] %v687_v12  ;;  %v692_v23 = vmax.f32 %v180_v20, 0.0  ;;  %v693_v24 = vmax.f32 %v181_v21, 0.0  ;;  %v183_v26 = vld [vmem:[%s2054_s30 + $0x168] sm:$0xff] }
  0x4e   : > { %1200 = vst [vmem:[%s2069_s17 + $0x130] sm:$0xff] %v688_v13  ;;  %v694_v25 = vmax.f32 %v182_v22, 0.0  ;;  %v184_v27 = vld [vmem:[%s2054_s30 + $0x170] sm:$0xff]  ;;  %v185_v28 = vld [vmem:[%s2054_s30 + $0x178] sm:$0xff]  ;;  %1201 = vst [vmem:[%s2069_s17 + $0x138] sm:$0xff] %v689_v17  ;;  %v695_v29 = vmax.f32 %v183_v26, 0.0 }
  0x4f   : > { %1202 = vst [vmem:[%s2069_s17 + $0x140] sm:$0xff] %v690_v18  ;;  %1203 = vst [vmem:[%s2069_s17 + $0x148] sm:$0xff] %v691_v19  ;;  %v696_v30 = vmax.f32 %v184_v27, 0.0  ;;  %v697_v31 = vmax.f32 %v185_v28, 0.0  ;;  %v186_v32 = vld [vmem:[%s2054_s30 + $0x180] sm:$0xff]  ;;  %v187_v33 = vld [vmem:[%s2054_s30 + $0x188] sm:$0xff] }
  0x50   : > { %v188_v34 = vld [vmem:[%s2054_s30 + $0x190] sm:$0xff]  ;;  %1204 = vst [vmem:[%s2069_s17 + $0x150] sm:$0xff] %v692_v23  ;;  %1205 = vst [vmem:[%s2069_s17 + $0x158] sm:$0xff] %v693_v24  ;;  %v698_v35 = vmax.f32 %v186_v32, 0.0  ;;  %v699_v36 = vmax.f32 %v187_v33, 0.0  ;;  %v189_v38 = vld [vmem:[%s2054_s30 + $0x198] sm:$0xff] }
  0x51   : > { %1206 = vst [vmem:[%s2069_s17 + $0x160] sm:$0xff] %v694_v25  ;;  %v700_v37 = vmax.f32 %v188_v34, 0.0  ;;  %v190_v39 = vld [vmem:[%s2054_s30 + $0x1a0] sm:$0xff]  ;;  %v191_v40 = vld [vmem:[%s2054_s30 + $0x1a8] sm:$0xff]  ;;  %1207 = vst [vmem:[%s2069_s17 + $0x168] sm:$0xff] %v695_v29  ;;  %v701_v41 = vmax.f32 %v189_v38, 0.0 }
  0x52   : > { %1208 = vst [vmem:[%s2069_s17 + $0x170] sm:$0xff] %v696_v30  ;;  %1209 = vst [vmem:[%s2069_s17 + $0x178] sm:$0xff] %v697_v31  ;;  %v702_v42 = vmax.f32 %v190_v39, 0.0  ;;  %v703_v43 = vmax.f32 %v191_v40, 0.0  ;;  %v192_v44 = vld [vmem:[%s2054_s30 + $0x1b0] sm:$0xff]  ;;  %v193_v45 = vld [vmem:[%s2054_s30 + $0x1b8] sm:$0xff] }
  0x53   : > { %v194_v46 = vld [vmem:[%s2054_s30 + $0x1c0] sm:$0xff]  ;;  %1210 = vst [vmem:[%s2069_s17 + $0x180] sm:$0xff] %v698_v35  ;;  %1211 = vst [vmem:[%s2069_s17 + $0x188] sm:$0xff] %v699_v36  ;;  %v704_v47 = vmax.f32 %v192_v44, 0.0  ;;  %v705_v48 = vmax.f32 %v193_v45, 0.0  ;;  %v195_v50 = vld [vmem:[%s2054_s30 + $0x1c8] sm:$0xff] }
  0x54   : > { %1212 = vst [vmem:[%s2069_s17 + $0x190] sm:$0xff] %v700_v37  ;;  %v706_v49 = vmax.f32 %v194_v46, 0.0  ;;  %v196_v51 = vld [vmem:[%s2054_s30 + $0x1d0] sm:$0xff]  ;;  %v197_v52 = vld [vmem:[%s2054_s30 + $0x1d8] sm:$0xff]  ;;  %1213 = vst [vmem:[%s2069_s17 + $0x198] sm:$0xff] %v701_v41  ;;  %v707_v53 = vmax.f32 %v195_v50, 0.0 }
  0x55   : > { %1214 = vst [vmem:[%s2069_s17 + $0x1a0] sm:$0xff] %v702_v42  ;;  %1215 = vst [vmem:[%s2069_s17 + $0x1a8] sm:$0xff] %v703_v43  ;;  %v708_v54 = vmax.f32 %v196_v51, 0.0  ;;  %v709_v55 = vmax.f32 %v197_v52, 0.0  ;;  %v198_v56 = vld [vmem:[%s2054_s30 + $0x1e0] sm:$0xff]  ;;  %v199_v57 = vld [vmem:[%s2054_s30 + $0x1e8] sm:$0xff] }
  0x56   : > { %v200_v58 = vld [vmem:[%s2054_s30 + $0x1f0] sm:$0xff]  ;;  %1216 = vst [vmem:[%s2069_s17 + $0x1b0] sm:$0xff] %v704_v47  ;;  %1217 = vst [vmem:[%s2069_s17 + $0x1b8] sm:$0xff] %v705_v48  ;;  %v710_v59 = vmax.f32 %v198_v56, 0.0  ;;  %v711_v60 = vmax.f32 %v199_v57, 0.0  ;;  %v201_v62 = vld [vmem:[%s2054_s30 + $0x1f8] sm:$0xff] }
  0x57   : > { %1218 = vst [vmem:[%s2069_s17 + $0x1c0] sm:$0xff] %v706_v49  ;;  %v712_v61 = vmax.f32 %v200_v58, 0.0  ;;  %v202_v63 = vld [vmem:[%s2054_s30 + $0x200] sm:$0xff]  ;;  %v203_v0 = vld [vmem:[%s2054_s30 + $0x208] sm:$0xff]  ;;  %1219 = vst [vmem:[%s2069_s17 + $0x1c8] sm:$0xff] %v707_v53  ;;  %v713_v1 = vmax.f32 %v201_v62, 0.0 }
  0x58   : > { %1220 = vst [vmem:[%s2069_s17 + $0x1d0] sm:$0xff] %v708_v54  ;;  %1221 = vst [vmem:[%s2069_s17 + $0x1d8] sm:$0xff] %v709_v55  ;;  %v714_v2 = vmax.f32 %v202_v63, 0.0  ;;  %v715_v3 = vmax.f32 %v203_v0, 0.0  ;;  %v204_v4 = vld [vmem:[%s2054_s30 + $0x210] sm:$0xff]  ;;  %v205_v5 = vld [vmem:[%s2054_s30 + $0x218] sm:$0xff] }
  0x59   : > { %v206_v6 = vld [vmem:[%s2054_s30 + $0x220] sm:$0xff]  ;;  %1222 = vst [vmem:[%s2069_s17 + $0x1e0] sm:$0xff] %v710_v59  ;;  %1223 = vst [vmem:[%s2069_s17 + $0x1e8] sm:$0xff] %v711_v60  ;;  %v716_v7 = vmax.f32 %v204_v4, 0.0  ;;  %v717_v8 = vmax.f32 %v205_v5, 0.0  ;;  %v207_v10 = vld [vmem:[%s2054_s30 + $0x228] sm:$0xff] }
  0x5a   : > { %1224 = vst [vmem:[%s2069_s17 + $0x1f0] sm:$0xff] %v712_v61  ;;  %v718_v9 = vmax.f32 %v206_v6, 0.0  ;;  %v208_v11 = vld [vmem:[%s2054_s30 + $0x230] sm:$0xff]  ;;  %v209_v12 = vld [vmem:[%s2054_s30 + $0x238] sm:$0xff]  ;;  %1225 = vst [vmem:[%s2069_s17 + $0x1f8] sm:$0xff] %v713_v1  ;;  %v719_v13 = vmax.f32 %v207_v10, 0.0 }
  0x5b   : > { %1226 = vst [vmem:[%s2069_s17 + $0x200] sm:$0xff] %v714_v2  ;;  %1227 = vst [vmem:[%s2069_s17 + $0x208] sm:$0xff] %v715_v3  ;;  %v720_v14 = vmax.f32 %v208_v11, 0.0  ;;  %v721_v15 = vmax.f32 %v209_v12, 0.0  ;;  %v210_v16 = vld [vmem:[%s2054_s30 + $0x240] sm:$0xff]  ;;  %v211_v17 = vld [vmem:[%s2054_s30 + $0x248] sm:$0xff] }
  0x5c   : > { %v212_v18 = vld [vmem:[%s2054_s30 + $0x250] sm:$0xff]  ;;  %1228 = vst [vmem:[%s2069_s17 + $0x210] sm:$0xff] %v716_v7  ;;  %1229 = vst [vmem:[%s2069_s17 + $0x218] sm:$0xff] %v717_v8  ;;  %v722_v19 = vmax.f32 %v210_v16, 0.0  ;;  %v723_v20 = vmax.f32 %v211_v17, 0.0  ;;  %v213_v22 = vld [vmem:[%s2054_s30 + $0x258] sm:$0xff] }
  0x5d   : > { %1230 = vst [vmem:[%s2069_s17 + $0x220] sm:$0xff] %v718_v9  ;;  %v724_v21 = vmax.f32 %v212_v18, 0.0  ;;  %v214_v23 = vld [vmem:[%s2054_s30 + $0x260] sm:$0xff]  ;;  %v215_v24 = vld [vmem:[%s2054_s30 + $0x268] sm:$0xff]  ;;  %1231 = vst [vmem:[%s2069_s17 + $0x228] sm:$0xff] %v719_v13  ;;  %v725_v25 = vmax.f32 %v213_v22, 0.0 }
  0x5e   : > { %1232 = vst [vmem:[%s2069_s17 + $0x230] sm:$0xff] %v720_v14  ;;  %1233 = vst [vmem:[%s2069_s17 + $0x238] sm:$0xff] %v721_v15  ;;  %v726_v26 = vmax.f32 %v214_v23, 0.0  ;;  %v727_v27 = vmax.f32 %v215_v24, 0.0  ;;  %v216_v28 = vld [vmem:[%s2054_s30 + $0x270] sm:$0xff]  ;;  %v217_v29 = vld [vmem:[%s2054_s30 + $0x278] sm:$0xff] }
  0x5f   : > { %v218_v30 = vld [vmem:[%s2054_s30 + $0x280] sm:$0xff]  ;;  %1234 = vst [vmem:[%s2069_s17 + $0x240] sm:$0xff] %v722_v19  ;;  %1235 = vst [vmem:[%s2069_s17 + $0x248] sm:$0xff] %v723_v20  ;;  %v728_v31 = vmax.f32 %v216_v28, 0.0  ;;  %v729_v32 = vmax.f32 %v217_v29, 0.0  ;;  %v219_v34 = vld [vmem:[%s2054_s30 + $0x288] sm:$0xff] }
  0x60   : > { %1236 = vst [vmem:[%s2069_s17 + $0x250] sm:$0xff] %v724_v21  ;;  %v730_v33 = vmax.f32 %v218_v30, 0.0  ;;  %v220_v35 = vld [vmem:[%s2054_s30 + $0x290] sm:$0xff]  ;;  %v221_v36 = vld [vmem:[%s2054_s30 + $0x298] sm:$0xff]  ;;  %1237 = vst [vmem:[%s2069_s17 + $0x258] sm:$0xff] %v725_v25  ;;  %v731_v37 = vmax.f32 %v219_v34, 0.0 }
  0x61   : > { %1238 = vst [vmem:[%s2069_s17 + $0x260] sm:$0xff] %v726_v26  ;;  %1239 = vst [vmem:[%s2069_s17 + $0x268] sm:$0xff] %v727_v27  ;;  %v732_v38 = vmax.f32 %v220_v35, 0.0  ;;  %v733_v39 = vmax.f32 %v221_v36, 0.0  ;;  %v222_v40 = vld [vmem:[%s2054_s30 + $0x2a0] sm:$0xff]  ;;  %v223_v41 = vld [vmem:[%s2054_s30 + $0x2a8] sm:$0xff] }
  0x62   : > { %v224_v42 = vld [vmem:[%s2054_s30 + $0x2b0] sm:$0xff]  ;;  %1240 = vst [vmem:[%s2069_s17 + $0x270] sm:$0xff] %v728_v31  ;;  %1241 = vst [vmem:[%s2069_s17 + $0x278] sm:$0xff] %v729_v32  ;;  %v734_v43 = vmax.f32 %v222_v40, 0.0  ;;  %v735_v44 = vmax.f32 %v223_v41, 0.0  ;;  %v225_v46 = vld [vmem:[%s2054_s30 + $0x2b8] sm:$0xff] }
  0x63   : > { %1242 = vst [vmem:[%s2069_s17 + $0x280] sm:$0xff] %v730_v33  ;;  %v736_v45 = vmax.f32 %v224_v42, 0.0  ;;  %v226_v47 = vld [vmem:[%s2054_s30 + $0x2c0] sm:$0xff]  ;;  %v227_v48 = vld [vmem:[%s2054_s30 + $0x2c8] sm:$0xff]  ;;  %1243 = vst [vmem:[%s2069_s17 + $0x288] sm:$0xff] %v731_v37  ;;  %v737_v49 = vmax.f32 %v225_v46, 0.0 }
  0x64   : > { %1244 = vst [vmem:[%s2069_s17 + $0x290] sm:$0xff] %v732_v38  ;;  %1245 = vst [vmem:[%s2069_s17 + $0x298] sm:$0xff] %v733_v39  ;;  %v738_v50 = vmax.f32 %v226_v47, 0.0  ;;  %v739_v51 = vmax.f32 %v227_v48, 0.0  ;;  %v228_v52 = vld [vmem:[%s2054_s30 + $0x2d0] sm:$0xff]  ;;  %v229_v53 = vld [vmem:[%s2054_s30 + $0x2d8] sm:$0xff] }
  0x65   : > { %v230_v54 = vld [vmem:[%s2054_s30 + $0x2e0] sm:$0xff]  ;;  %1246 = vst [vmem:[%s2069_s17 + $0x2a0] sm:$0xff] %v734_v43  ;;  %1247 = vst [vmem:[%s2069_s17 + $0x2a8] sm:$0xff] %v735_v44  ;;  %v740_v55 = vmax.f32 %v228_v52, 0.0  ;;  %v741_v56 = vmax.f32 %v229_v53, 0.0  ;;  %v231_v58 = vld [vmem:[%s2054_s30 + $0x2e8] sm:$0xff] }
  0x66   : > { %1248 = vst [vmem:[%s2069_s17 + $0x2b0] sm:$0xff] %v736_v45  ;;  %v742_v57 = vmax.f32 %v230_v54, 0.0  ;;  %v232_v59 = vld [vmem:[%s2054_s30 + $0x2f0] sm:$0xff]  ;;  %v233_v60 = vld [vmem:[%s2054_s30 + $0x2f8] sm:$0xff]  ;;  %1249 = vst [vmem:[%s2069_s17 + $0x2b8] sm:$0xff] %v737_v49  ;;  %v743_v61 = vmax.f32 %v231_v58, 0.0 }
  0x67   : > { %1250 = vst [vmem:[%s2069_s17 + $0x2c0] sm:$0xff] %v738_v50  ;;  %1251 = vst [vmem:[%s2069_s17 + $0x2c8] sm:$0xff] %v739_v51  ;;  %v744_v62 = vmax.f32 %v232_v59, 0.0  ;;  %v745_v63 = vmax.f32 %v233_v60, 0.0  ;;  %v234_v0 = vld [vmem:[%s2054_s30 + $0x300] sm:$0xff]  ;;  %v235_v1 = vld [vmem:[%s2054_s30 + $0x308] sm:$0xff] }
  0x68   : > { %v236_v2 = vld [vmem:[%s2054_s30 + $0x310] sm:$0xff]  ;;  %1252 = vst [vmem:[%s2069_s17 + $0x2d0] sm:$0xff] %v740_v55  ;;  %1253 = vst [vmem:[%s2069_s17 + $0x2d8] sm:$0xff] %v741_v56  ;;  %v746_v3 = vmax.f32 %v234_v0, 0.0  ;;  %v747_v4 = vmax.f32 %v235_v1, 0.0  ;;  %v237_v6 = vld [vmem:[%s2054_s30 + $0x318] sm:$0xff] }
  0x69   : > { %1254 = vst [vmem:[%s2069_s17 + $0x2e0] sm:$0xff] %v742_v57  ;;  %v748_v5 = vmax.f32 %v236_v2, 0.0  ;;  %v238_v7 = vld [vmem:[%s2054_s30 + $0x320] sm:$0xff]  ;;  %v239_v8 = vld [vmem:[%s2054_s30 + $0x328] sm:$0xff]  ;;  %1255 = vst [vmem:[%s2069_s17 + $0x2e8] sm:$0xff] %v743_v61  ;;  %v749_v9 = vmax.f32 %v237_v6, 0.0 }
  0x6a   : > { %1256 = vst [vmem:[%s2069_s17 + $0x2f0] sm:$0xff] %v744_v62  ;;  %1257 = vst [vmem:[%s2069_s17 + $0x2f8] sm:$0xff] %v745_v63  ;;  %v750_v10 = vmax.f32 %v238_v7, 0.0  ;;  %v751_v11 = vmax.f32 %v239_v8, 0.0  ;;  %v240_v12 = vld [vmem:[%s2054_s30 + $0x330] sm:$0xff]  ;;  %v241_v13 = vld [vmem:[%s2054_s30 + $0x338] sm:$0xff] }
  0x6b   : > { %v242_v14 = vld [vmem:[%s2054_s30 + $0x340] sm:$0xff]  ;;  %1258 = vst [vmem:[%s2069_s17 + $0x300] sm:$0xff] %v746_v3  ;;  %1259 = vst [vmem:[%s2069_s17 + $0x308] sm:$0xff] %v747_v4  ;;  %v752_v15 = vmax.f32 %v240_v12, 0.0  ;;  %v753_v16 = vmax.f32 %v241_v13, 0.0  ;;  %v243_v18 = vld [vmem:[%s2054_s30 + $0x348] sm:$0xff] }
  0x6c   : > { %1260 = vst [vmem:[%s2069_s17 + $0x310] sm:$0xff] %v748_v5  ;;  %v754_v17 = vmax.f32 %v242_v14, 0.0  ;;  %v244_v19 = vld [vmem:[%s2054_s30 + $0x350] sm:$0xff]  ;;  %v245_v20 = vld [vmem:[%s2054_s30 + $0x358] sm:$0xff]  ;;  %1261 = vst [vmem:[%s2069_s17 + $0x318] sm:$0xff] %v749_v9  ;;  %v755_v21 = vmax.f32 %v243_v18, 0.0 }
  0x6d   : > { %1262 = vst [vmem:[%s2069_s17 + $0x320] sm:$0xff] %v750_v10  ;;  %1263 = vst [vmem:[%s2069_s17 + $0x328] sm:$0xff] %v751_v11  ;;  %v756_v22 = vmax.f32 %v244_v19, 0.0  ;;  %v757_v23 = vmax.f32 %v245_v20, 0.0  ;;  %v246_v24 = vld [vmem:[%s2054_s30 + $0x360] sm:$0xff]  ;;  %v247_v25 = vld [vmem:[%s2054_s30 + $0x368] sm:$0xff] }
  0x6e   : > { %v248_v26 = vld [vmem:[%s2054_s30 + $0x370] sm:$0xff]  ;;  %1264 = vst [vmem:[%s2069_s17 + $0x330] sm:$0xff] %v752_v15  ;;  %1265 = vst [vmem:[%s2069_s17 + $0x338] sm:$0xff] %v753_v16  ;;  %v758_v27 = vmax.f32 %v246_v24, 0.0  ;;  %v759_v28 = vmax.f32 %v247_v25, 0.0  ;;  %v249_v30 = vld [vmem:[%s2054_s30 + $0x378] sm:$0xff] }
  0x6f   : > { %1266 = vst [vmem:[%s2069_s17 + $0x340] sm:$0xff] %v754_v17  ;;  %v760_v29 = vmax.f32 %v248_v26, 0.0  ;;  %v250_v31 = vld [vmem:[%s2054_s30 + $0x380] sm:$0xff]  ;;  %v251_v32 = vld [vmem:[%s2054_s30 + $0x388] sm:$0xff]  ;;  %1267 = vst [vmem:[%s2069_s17 + $0x348] sm:$0xff] %v755_v21  ;;  %v761_v33 = vmax.f32 %v249_v30, 0.0 }
  0x70   : > { %1268 = vst [vmem:[%s2069_s17 + $0x350] sm:$0xff] %v756_v22  ;;  %1269 = vst [vmem:[%s2069_s17 + $0x358] sm:$0xff] %v757_v23  ;;  %v762_v34 = vmax.f32 %v250_v31, 0.0  ;;  %v763_v35 = vmax.f32 %v251_v32, 0.0  ;;  %v252_v36 = vld [vmem:[%s2054_s30 + $0x390] sm:$0xff]  ;;  %v253_v37 = vld [vmem:[%s2054_s30 + $0x398] sm:$0xff] }
  0x71   : > { %v254_v38 = vld [vmem:[%s2054_s30 + $0x3a0] sm:$0xff]  ;;  %1270 = vst [vmem:[%s2069_s17 + $0x360] sm:$0xff] %v758_v27  ;;  %1271 = vst [vmem:[%s2069_s17 + $0x368] sm:$0xff] %v759_v28  ;;  %v764_v39 = vmax.f32 %v252_v36, 0.0  ;;  %v765_v40 = vmax.f32 %v253_v37, 0.0  ;;  %v255_v42 = vld [vmem:[%s2054_s30 + $0x3a8] sm:$0xff] }
  0x72   : > { %1272 = vst [vmem:[%s2069_s17 + $0x370] sm:$0xff] %v760_v29  ;;  %v766_v41 = vmax.f32 %v254_v38, 0.0  ;;  %v256_v43 = vld [vmem:[%s2054_s30 + $0x3b0] sm:$0xff]  ;;  %v257_v44 = vld [vmem:[%s2054_s30 + $0x3b8] sm:$0xff]  ;;  %1273 = vst [vmem:[%s2069_s17 + $0x378] sm:$0xff] %v761_v33  ;;  %v767_v45 = vmax.f32 %v255_v42, 0.0 }
  0x73   : > { %1274 = vst [vmem:[%s2069_s17 + $0x380] sm:$0xff] %v762_v34  ;;  %1275 = vst [vmem:[%s2069_s17 + $0x388] sm:$0xff] %v763_v35  ;;  %v768_v46 = vmax.f32 %v256_v43, 0.0  ;;  %v769_v47 = vmax.f32 %v257_v44, 0.0  ;;  %v258_v48 = vld [vmem:[%s2054_s30 + $0x3c0] sm:$0xff]  ;;  %v259_v49 = vld [vmem:[%s2054_s30 + $0x3c8] sm:$0xff] }
  0x74   : > { %v260_v50 = vld [vmem:[%s2054_s30 + $0x3d0] sm:$0xff]  ;;  %1276 = vst [vmem:[%s2069_s17 + $0x390] sm:$0xff] %v764_v39  ;;  %1277 = vst [vmem:[%s2069_s17 + $0x398] sm:$0xff] %v765_v40  ;;  %v770_v51 = vmax.f32 %v258_v48, 0.0  ;;  %v771_v52 = vmax.f32 %v259_v49, 0.0  ;;  %v261_v54 = vld [vmem:[%s2054_s30 + $0x3d8] sm:$0xff] }
  0x75   : > { %1278 = vst [vmem:[%s2069_s17 + $0x3a0] sm:$0xff] %v766_v41  ;;  %v772_v53 = vmax.f32 %v260_v50, 0.0  ;;  %v262_v55 = vld [vmem:[%s2054_s30 + $0x3e0] sm:$0xff]  ;;  %v263_v56 = vld [vmem:[%s2054_s30 + $0x3e8] sm:$0xff]  ;;  %1279 = vst [vmem:[%s2069_s17 + $0x3a8] sm:$0xff] %v767_v45  ;;  %v773_v57 = vmax.f32 %v261_v54, 0.0 }
  0x76   : > { %1280 = vst [vmem:[%s2069_s17 + $0x3b0] sm:$0xff] %v768_v46  ;;  %1281 = vst [vmem:[%s2069_s17 + $0x3b8] sm:$0xff] %v769_v47  ;;  %v774_v58 = vmax.f32 %v262_v55, 0.0  ;;  %v775_v59 = vmax.f32 %v263_v56, 0.0  ;;  %v264_v60 = vld [vmem:[%s2054_s30 + $0x3f0] sm:$0xff]  ;;  %v265_v61 = vld [vmem:[%s2054_s30 + $0x3f8] sm:$0xff] }
  0x77   : > { %v266_v62 = vld [vmem:[%s2054_s30 + $0x400] sm:$0xff]  ;;  %1282 = vst [vmem:[%s2069_s17 + $0x3c0] sm:$0xff] %v770_v51  ;;  %1283 = vst [vmem:[%s2069_s17 + $0x3c8] sm:$0xff] %v771_v52  ;;  %v776_v63 = vmax.f32 %v264_v60, 0.0  ;;  %v777_v0 = vmax.f32 %v265_v61, 0.0  ;;  %v267_v2 = vld [vmem:[%s2054_s30 + $0x408] sm:$0xff] }
  0x78   : > { %1284 = vst [vmem:[%s2069_s17 + $0x3d0] sm:$0xff] %v772_v53  ;;  %v778_v1 = vmax.f32 %v266_v62, 0.0  ;;  %v268_v3 = vld [vmem:[%s2054_s30 + $0x410] sm:$0xff]  ;;  %v269_v4 = vld [vmem:[%s2054_s30 + $0x418] sm:$0xff]  ;;  %1285 = vst [vmem:[%s2069_s17 + $0x3d8] sm:$0xff] %v773_v57  ;;  %v779_v5 = vmax.f32 %v267_v2, 0.0 }
  0x79   : > { %1286 = vst [vmem:[%s2069_s17 + $0x3e0] sm:$0xff] %v774_v58  ;;  %1287 = vst [vmem:[%s2069_s17 + $0x3e8] sm:$0xff] %v775_v59  ;;  %v780_v6 = vmax.f32 %v268_v3, 0.0  ;;  %v781_v7 = vmax.f32 %v269_v4, 0.0  ;;  %v270_v8 = vld [vmem:[%s2054_s30 + $0x420] sm:$0xff]  ;;  %v271_v9 = vld [vmem:[%s2054_s30 + $0x428] sm:$0xff] }
  0x7a   : > { %v272_v10 = vld [vmem:[%s2054_s30 + $0x430] sm:$0xff]  ;;  %1288 = vst [vmem:[%s2069_s17 + $0x3f0] sm:$0xff] %v776_v63  ;;  %1289 = vst [vmem:[%s2069_s17 + $0x3f8] sm:$0xff] %v777_v0  ;;  %v782_v11 = vmax.f32 %v270_v8, 0.0  ;;  %v783_v12 = vmax.f32 %v271_v9, 0.0  ;;  %v273_v14 = vld [vmem:[%s2054_s30 + $0x438] sm:$0xff] }
  0x7b   : > { %1290 = vst [vmem:[%s2069_s17 + $0x400] sm:$0xff] %v778_v1  ;;  %v784_v13 = vmax.f32 %v272_v10, 0.0  ;;  %v274_v15 = vld [vmem:[%s2054_s30 + $0x440] sm:$0xff]  ;;  %v275_v16 = vld [vmem:[%s2054_s30 + $0x448] sm:$0xff]  ;;  %1291 = vst [vmem:[%s2069_s17 + $0x408] sm:$0xff] %v779_v5  ;;  %v785_v17 = vmax.f32 %v273_v14, 0.0 }
  0x7c   : > { %1292 = vst [vmem:[%s2069_s17 + $0x410] sm:$0xff] %v780_v6  ;;  %1293 = vst [vmem:[%s2069_s17 + $0x418] sm:$0xff] %v781_v7  ;;  %v786_v18 = vmax.f32 %v274_v15, 0.0  ;;  %v787_v19 = vmax.f32 %v275_v16, 0.0  ;;  %v276_v20 = vld [vmem:[%s2054_s30 + $0x450] sm:$0xff]  ;;  %v277_v21 = vld [vmem:[%s2054_s30 + $0x458] sm:$0xff] }
  0x7d   : > { %v278_v22 = vld [vmem:[%s2054_s30 + $0x460] sm:$0xff]  ;;  %1294 = vst [vmem:[%s2069_s17 + $0x420] sm:$0xff] %v782_v11  ;;  %1295 = vst [vmem:[%s2069_s17 + $0x428] sm:$0xff] %v783_v12  ;;  %v788_v23 = vmax.f32 %v276_v20, 0.0  ;;  %v789_v24 = vmax.f32 %v277_v21, 0.0  ;;  %v279_v26 = vld [vmem:[%s2054_s30 + $0x468] sm:$0xff] }
  0x7e   : > { %1296 = vst [vmem:[%s2069_s17 + $0x430] sm:$0xff] %v784_v13  ;;  %v790_v25 = vmax.f32 %v278_v22, 0.0  ;;  %v280_v27 = vld [vmem:[%s2054_s30 + $0x470] sm:$0xff]  ;;  %v281_v28 = vld [vmem:[%s2054_s30 + $0x478] sm:$0xff]  ;;  %1297 = vst [vmem:[%s2069_s17 + $0x438] sm:$0xff] %v785_v17  ;;  %v791_v29 = vmax.f32 %v279_v26, 0.0 }
  0x7f   : > { %1298 = vst [vmem:[%s2069_s17 + $0x440] sm:$0xff] %v786_v18  ;;  %1299 = vst [vmem:[%s2069_s17 + $0x448] sm:$0xff] %v787_v19  ;;  %v792_v30 = vmax.f32 %v280_v27, 0.0  ;;  %v793_v31 = vmax.f32 %v281_v28, 0.0  ;;  %v282_v32 = vld [vmem:[%s2054_s30 + $0x480] sm:$0xff]  ;;  %v283_v33 = vld [vmem:[%s2054_s30 + $0x488] sm:$0xff] }
  0x80   : > { %v284_v34 = vld [vmem:[%s2054_s30 + $0x490] sm:$0xff]  ;;  %1300 = vst [vmem:[%s2069_s17 + $0x450] sm:$0xff] %v788_v23  ;;  %1301 = vst [vmem:[%s2069_s17 + $0x458] sm:$0xff] %v789_v24  ;;  %v794_v35 = vmax.f32 %v282_v32, 0.0  ;;  %v795_v36 = vmax.f32 %v283_v33, 0.0  ;;  %v285_v38 = vld [vmem:[%s2054_s30 + $0x498] sm:$0xff] }
  0x81   : > { %1302 = vst [vmem:[%s2069_s17 + $0x460] sm:$0xff] %v790_v25  ;;  %v796_v37 = vmax.f32 %v284_v34, 0.0  ;;  %v286_v39 = vld [vmem:[%s2054_s30 + $0x4a0] sm:$0xff]  ;;  %v287_v40 = vld [vmem:[%s2054_s30 + $0x4a8] sm:$0xff]  ;;  %1303 = vst [vmem:[%s2069_s17 + $0x468] sm:$0xff] %v791_v29  ;;  %v797_v41 = vmax.f32 %v285_v38, 0.0 }
  0x82   : > { %1304 = vst [vmem:[%s2069_s17 + $0x470] sm:$0xff] %v792_v30  ;;  %1305 = vst [vmem:[%s2069_s17 + $0x478] sm:$0xff] %v793_v31  ;;  %v798_v42 = vmax.f32 %v286_v39, 0.0  ;;  %v799_v43 = vmax.f32 %v287_v40, 0.0  ;;  %v288_v44 = vld [vmem:[%s2054_s30 + $0x4b0] sm:$0xff]  ;;  %v289_v45 = vld [vmem:[%s2054_s30 + $0x4b8] sm:$0xff] }
  0x83   : > { %v290_v46 = vld [vmem:[%s2054_s30 + $0x4c0] sm:$0xff]  ;;  %1306 = vst [vmem:[%s2069_s17 + $0x480] sm:$0xff] %v794_v35  ;;  %1307 = vst [vmem:[%s2069_s17 + $0x488] sm:$0xff] %v795_v36  ;;  %v800_v47 = vmax.f32 %v288_v44, 0.0  ;;  %v801_v48 = vmax.f32 %v289_v45, 0.0  ;;  %v291_v50 = vld [vmem:[%s2054_s30 + $0x4c8] sm:$0xff] }
  0x84   : > { %1308 = vst [vmem:[%s2069_s17 + $0x490] sm:$0xff] %v796_v37  ;;  %v802_v49 = vmax.f32 %v290_v46, 0.0  ;;  %v292_v51 = vld [vmem:[%s2054_s30 + $0x4d0] sm:$0xff]  ;;  %v293_v52 = vld [vmem:[%s2054_s30 + $0x4d8] sm:$0xff]  ;;  %1309 = vst [vmem:[%s2069_s17 + $0x498] sm:$0xff] %v797_v41  ;;  %v803_v53 = vmax.f32 %v291_v50, 0.0 }
  0x85   : > { %1310 = vst [vmem:[%s2069_s17 + $0x4a0] sm:$0xff] %v798_v42  ;;  %1311 = vst [vmem:[%s2069_s17 + $0x4a8] sm:$0xff] %v799_v43  ;;  %v804_v54 = vmax.f32 %v292_v51, 0.0  ;;  %v805_v55 = vmax.f32 %v293_v52, 0.0  ;;  %v294_v56 = vld [vmem:[%s2054_s30 + $0x4e0] sm:$0xff]  ;;  %v295_v57 = vld [vmem:[%s2054_s30 + $0x4e8] sm:$0xff] }
  0x86   : > { %v296_v58 = vld [vmem:[%s2054_s30 + $0x4f0] sm:$0xff]  ;;  %1312 = vst [vmem:[%s2069_s17 + $0x4b0] sm:$0xff] %v800_v47  ;;  %1313 = vst [vmem:[%s2069_s17 + $0x4b8] sm:$0xff] %v801_v48  ;;  %v806_v59 = vmax.f32 %v294_v56, 0.0  ;;  %v807_v60 = vmax.f32 %v295_v57, 0.0  ;;  %v297_v62 = vld [vmem:[%s2054_s30 + $0x4f8] sm:$0xff] }
  0x87   : > { %1314 = vst [vmem:[%s2069_s17 + $0x4c0] sm:$0xff] %v802_v49  ;;  %v808_v61 = vmax.f32 %v296_v58, 0.0  ;;  %v298_v63 = vld [vmem:[%s2054_s30 + $0x500] sm:$0xff]  ;;  %v299_v0 = vld [vmem:[%s2054_s30 + $0x508] sm:$0xff]  ;;  %1315 = vst [vmem:[%s2069_s17 + $0x4c8] sm:$0xff] %v803_v53  ;;  %v809_v1 = vmax.f32 %v297_v62, 0.0 }
  0x88   : > { %1316 = vst [vmem:[%s2069_s17 + $0x4d0] sm:$0xff] %v804_v54  ;;  %1317 = vst [vmem:[%s2069_s17 + $0x4d8] sm:$0xff] %v805_v55  ;;  %v810_v2 = vmax.f32 %v298_v63, 0.0  ;;  %v811_v3 = vmax.f32 %v299_v0, 0.0  ;;  %v300_v4 = vld [vmem:[%s2054_s30 + $0x510] sm:$0xff]  ;;  %v301_v5 = vld [vmem:[%s2054_s30 + $0x518] sm:$0xff] }
  0x89   : > { %v302_v6 = vld [vmem:[%s2054_s30 + $0x520] sm:$0xff]  ;;  %1318 = vst [vmem:[%s2069_s17 + $0x4e0] sm:$0xff] %v806_v59  ;;  %1319 = vst [vmem:[%s2069_s17 + $0x4e8] sm:$0xff] %v807_v60  ;;  %v812_v7 = vmax.f32 %v300_v4, 0.0  ;;  %v813_v8 = vmax.f32 %v301_v5, 0.0  ;;  %v303_v10 = vld [vmem:[%s2054_s30 + $0x528] sm:$0xff] }
  0x8a   : > { %1320 = vst [vmem:[%s2069_s17 + $0x4f0] sm:$0xff] %v808_v61  ;;  %v814_v9 = vmax.f32 %v302_v6, 0.0  ;;  %v304_v11 = vld [vmem:[%s2054_s30 + $0x530] sm:$0xff]  ;;  %v305_v12 = vld [vmem:[%s2054_s30 + $0x538] sm:$0xff]  ;;  %1321 = vst [vmem:[%s2069_s17 + $0x4f8] sm:$0xff] %v809_v1  ;;  %v815_v13 = vmax.f32 %v303_v10, 0.0 }
  0x8b   : > { %1322 = vst [vmem:[%s2069_s17 + $0x500] sm:$0xff] %v810_v2  ;;  %1323 = vst [vmem:[%s2069_s17 + $0x508] sm:$0xff] %v811_v3  ;;  %v816_v14 = vmax.f32 %v304_v11, 0.0  ;;  %v817_v15 = vmax.f32 %v305_v12, 0.0  ;;  %v306_v16 = vld [vmem:[%s2054_s30 + $0x540] sm:$0xff]  ;;  %v307_v17 = vld [vmem:[%s2054_s30 + $0x548] sm:$0xff] }
  0x8c   : > { %v308_v18 = vld [vmem:[%s2054_s30 + $0x550] sm:$0xff]  ;;  %1324 = vst [vmem:[%s2069_s17 + $0x510] sm:$0xff] %v812_v7  ;;  %1325 = vst [vmem:[%s2069_s17 + $0x518] sm:$0xff] %v813_v8  ;;  %v818_v19 = vmax.f32 %v306_v16, 0.0  ;;  %v819_v20 = vmax.f32 %v307_v17, 0.0  ;;  %v309_v22 = vld [vmem:[%s2054_s30 + $0x558] sm:$0xff] }
  0x8d   : > { %1326 = vst [vmem:[%s2069_s17 + $0x520] sm:$0xff] %v814_v9  ;;  %v820_v21 = vmax.f32 %v308_v18, 0.0  ;;  %v310_v23 = vld [vmem:[%s2054_s30 + $0x560] sm:$0xff]  ;;  %v311_v24 = vld [vmem:[%s2054_s30 + $0x568] sm:$0xff]  ;;  %1327 = vst [vmem:[%s2069_s17 + $0x528] sm:$0xff] %v815_v13  ;;  %v821_v25 = vmax.f32 %v309_v22, 0.0 }
  0x8e   : > { %1328 = vst [vmem:[%s2069_s17 + $0x530] sm:$0xff] %v816_v14  ;;  %1329 = vst [vmem:[%s2069_s17 + $0x538] sm:$0xff] %v817_v15  ;;  %v822_v26 = vmax.f32 %v310_v23, 0.0  ;;  %v823_v27 = vmax.f32 %v311_v24, 0.0  ;;  %v312_v28 = vld [vmem:[%s2054_s30 + $0x570] sm:$0xff]  ;;  %v313_v29 = vld [vmem:[%s2054_s30 + $0x578] sm:$0xff] }
  0x8f   : > { %v314_v30 = vld [vmem:[%s2054_s30 + $0x580] sm:$0xff]  ;;  %1330 = vst [vmem:[%s2069_s17 + $0x540] sm:$0xff] %v818_v19  ;;  %1331 = vst [vmem:[%s2069_s17 + $0x548] sm:$0xff] %v819_v20  ;;  %v824_v31 = vmax.f32 %v312_v28, 0.0  ;;  %v825_v32 = vmax.f32 %v313_v29, 0.0  ;;  %v315_v34 = vld [vmem:[%s2054_s30 + $0x588] sm:$0xff] }
  0x90   : > { %1332 = vst [vmem:[%s2069_s17 + $0x550] sm:$0xff] %v820_v21  ;;  %v826_v33 = vmax.f32 %v314_v30, 0.0  ;;  %v316_v35 = vld [vmem:[%s2054_s30 + $0x590] sm:$0xff]  ;;  %v317_v36 = vld [vmem:[%s2054_s30 + $0x598] sm:$0xff]  ;;  %1333 = vst [vmem:[%s2069_s17 + $0x558] sm:$0xff] %v821_v25  ;;  %v827_v37 = vmax.f32 %v315_v34, 0.0 }
  0x91   : > { %1334 = vst [vmem:[%s2069_s17 + $0x560] sm:$0xff] %v822_v26  ;;  %1335 = vst [vmem:[%s2069_s17 + $0x568] sm:$0xff] %v823_v27  ;;  %v828_v38 = vmax.f32 %v316_v35, 0.0  ;;  %v829_v39 = vmax.f32 %v317_v36, 0.0  ;;  %v318_v40 = vld [vmem:[%s2054_s30 + $0x5a0] sm:$0xff]  ;;  %v319_v41 = vld [vmem:[%s2054_s30 + $0x5a8] sm:$0xff] }
  0x92   : > { %v320_v42 = vld [vmem:[%s2054_s30 + $0x5b0] sm:$0xff]  ;;  %1336 = vst [vmem:[%s2069_s17 + $0x570] sm:$0xff] %v824_v31  ;;  %1337 = vst [vmem:[%s2069_s17 + $0x578] sm:$0xff] %v825_v32  ;;  %v830_v43 = vmax.f32 %v318_v40, 0.0  ;;  %v831_v44 = vmax.f32 %v319_v41, 0.0  ;;  %v321_v46 = vld [vmem:[%s2054_s30 + $0x5b8] sm:$0xff] }
  0x93   : > { %1338 = vst [vmem:[%s2069_s17 + $0x580] sm:$0xff] %v826_v33  ;;  %v832_v45 = vmax.f32 %v320_v42, 0.0  ;;  %v322_v47 = vld [vmem:[%s2054_s30 + $0x5c0] sm:$0xff]  ;;  %v323_v48 = vld [vmem:[%s2054_s30 + $0x5c8] sm:$0xff]  ;;  %1339 = vst [vmem:[%s2069_s17 + $0x588] sm:$0xff] %v827_v37  ;;  %v833_v49 = vmax.f32 %v321_v46, 0.0 }
  0x94   : > { %1340 = vst [vmem:[%s2069_s17 + $0x590] sm:$0xff] %v828_v38  ;;  %1341 = vst [vmem:[%s2069_s17 + $0x598] sm:$0xff] %v829_v39  ;;  %v834_v50 = vmax.f32 %v322_v47, 0.0  ;;  %v835_v51 = vmax.f32 %v323_v48, 0.0  ;;  %v324_v52 = vld [vmem:[%s2054_s30 + $0x5d0] sm:$0xff]  ;;  %v325_v53 = vld [vmem:[%s2054_s30 + $0x5d8] sm:$0xff] }
  0x95   : > { %v326_v54 = vld [vmem:[%s2054_s30 + $0x5e0] sm:$0xff]  ;;  %1342 = vst [vmem:[%s2069_s17 + $0x5a0] sm:$0xff] %v830_v43  ;;  %1343 = vst [vmem:[%s2069_s17 + $0x5a8] sm:$0xff] %v831_v44  ;;  %v836_v55 = vmax.f32 %v324_v52, 0.0  ;;  %v837_v56 = vmax.f32 %v325_v53, 0.0  ;;  %v327_v58 = vld [vmem:[%s2054_s30 + $0x5e8] sm:$0xff] }
  0x96   : > { %1344 = vst [vmem:[%s2069_s17 + $0x5b0] sm:$0xff] %v832_v45  ;;  %v838_v57 = vmax.f32 %v326_v54, 0.0  ;;  %v328_v59 = vld [vmem:[%s2054_s30 + $0x5f0] sm:$0xff]  ;;  %v329_v60 = vld [vmem:[%s2054_s30 + $0x5f8] sm:$0xff]  ;;  %1345 = vst [vmem:[%s2069_s17 + $0x5b8] sm:$0xff] %v833_v49  ;;  %v839_v61 = vmax.f32 %v327_v58, 0.0 }
  0x97   : > { %1346 = vst [vmem:[%s2069_s17 + $0x5c0] sm:$0xff] %v834_v50  ;;  %1347 = vst [vmem:[%s2069_s17 + $0x5c8] sm:$0xff] %v835_v51  ;;  %v840_v62 = vmax.f32 %v328_v59, 0.0  ;;  %v841_v63 = vmax.f32 %v329_v60, 0.0  ;;  %v330_v0 = vld [vmem:[%s2054_s30 + $0x600] sm:$0xff]  ;;  %v331_v1 = vld [vmem:[%s2054_s30 + $0x608] sm:$0xff] }
  0x98   : > { %v332_v2 = vld [vmem:[%s2054_s30 + $0x610] sm:$0xff]  ;;  %1348 = vst [vmem:[%s2069_s17 + $0x5d0] sm:$0xff] %v836_v55  ;;  %1349 = vst [vmem:[%s2069_s17 + $0x5d8] sm:$0xff] %v837_v56  ;;  %v842_v3 = vmax.f32 %v330_v0, 0.0  ;;  %v843_v4 = vmax.f32 %v331_v1, 0.0  ;;  %v333_v6 = vld [vmem:[%s2054_s30 + $0x618] sm:$0xff] }
  0x99   : > { %1350 = vst [vmem:[%s2069_s17 + $0x5e0] sm:$0xff] %v838_v57  ;;  %v844_v5 = vmax.f32 %v332_v2, 0.0  ;;  %v334_v7 = vld [vmem:[%s2054_s30 + $0x620] sm:$0xff]  ;;  %v335_v8 = vld [vmem:[%s2054_s30 + $0x628] sm:$0xff]  ;;  %1351 = vst [vmem:[%s2069_s17 + $0x5e8] sm:$0xff] %v839_v61  ;;  %v845_v9 = vmax.f32 %v333_v6, 0.0 }
  0x9a   : > { %1352 = vst [vmem:[%s2069_s17 + $0x5f0] sm:$0xff] %v840_v62  ;;  %1353 = vst [vmem:[%s2069_s17 + $0x5f8] sm:$0xff] %v841_v63  ;;  %v846_v10 = vmax.f32 %v334_v7, 0.0  ;;  %v847_v11 = vmax.f32 %v335_v8, 0.0  ;;  %v336_v12 = vld [vmem:[%s2054_s30 + $0x630] sm:$0xff]  ;;  %v337_v13 = vld [vmem:[%s2054_s30 + $0x638] sm:$0xff] }
  0x9b   : > { %v338_v14 = vld [vmem:[%s2054_s30 + $0x640] sm:$0xff]  ;;  %1354 = vst [vmem:[%s2069_s17 + $0x600] sm:$0xff] %v842_v3  ;;  %1355 = vst [vmem:[%s2069_s17 + $0x608] sm:$0xff] %v843_v4  ;;  %v848_v15 = vmax.f32 %v336_v12, 0.0  ;;  %v849_v16 = vmax.f32 %v337_v13, 0.0  ;;  %v339_v18 = vld [vmem:[%s2054_s30 + $0x648] sm:$0xff] }
  0x9c   : > { %1356 = vst [vmem:[%s2069_s17 + $0x610] sm:$0xff] %v844_v5  ;;  %v850_v17 = vmax.f32 %v338_v14, 0.0  ;;  %v340_v19 = vld [vmem:[%s2054_s30 + $0x650] sm:$0xff]  ;;  %v341_v20 = vld [vmem:[%s2054_s30 + $0x658] sm:$0xff]  ;;  %1357 = vst [vmem:[%s2069_s17 + $0x618] sm:$0xff] %v845_v9  ;;  %v851_v21 = vmax.f32 %v339_v18, 0.0 }
  0x9d   : > { %1358 = vst [vmem:[%s2069_s17 + $0x620] sm:$0xff] %v846_v10  ;;  %1359 = vst [vmem:[%s2069_s17 + $0x628] sm:$0xff] %v847_v11  ;;  %v852_v22 = vmax.f32 %v340_v19, 0.0  ;;  %v853_v23 = vmax.f32 %v341_v20, 0.0  ;;  %v342_v24 = vld [vmem:[%s2054_s30 + $0x660] sm:$0xff]  ;;  %v343_v25 = vld [vmem:[%s2054_s30 + $0x668] sm:$0xff] }
  0x9e   : > { %v344_v26 = vld [vmem:[%s2054_s30 + $0x670] sm:$0xff]  ;;  %1360 = vst [vmem:[%s2069_s17 + $0x630] sm:$0xff] %v848_v15  ;;  %1361 = vst [vmem:[%s2069_s17 + $0x638] sm:$0xff] %v849_v16  ;;  %v854_v27 = vmax.f32 %v342_v24, 0.0  ;;  %v855_v28 = vmax.f32 %v343_v25, 0.0  ;;  %v345_v30 = vld [vmem:[%s2054_s30 + $0x678] sm:$0xff] }
  0x9f   : > { %1362 = vst [vmem:[%s2069_s17 + $0x640] sm:$0xff] %v850_v17  ;;  %v856_v29 = vmax.f32 %v344_v26, 0.0  ;;  %v346_v31 = vld [vmem:[%s2054_s30 + $0x680] sm:$0xff]  ;;  %v347_v32 = vld [vmem:[%s2054_s30 + $0x688] sm:$0xff]  ;;  %1363 = vst [vmem:[%s2069_s17 + $0x648] sm:$0xff] %v851_v21  ;;  %v857_v33 = vmax.f32 %v345_v30, 0.0 }
  0xa0   : > { %1364 = vst [vmem:[%s2069_s17 + $0x650] sm:$0xff] %v852_v22  ;;  %1365 = vst [vmem:[%s2069_s17 + $0x658] sm:$0xff] %v853_v23  ;;  %v858_v34 = vmax.f32 %v346_v31, 0.0  ;;  %v859_v35 = vmax.f32 %v347_v32, 0.0  ;;  %v348_v36 = vld [vmem:[%s2054_s30 + $0x690] sm:$0xff]  ;;  %v349_v37 = vld [vmem:[%s2054_s30 + $0x698] sm:$0xff] }
  0xa1   : > { %v350_v38 = vld [vmem:[%s2054_s30 + $0x6a0] sm:$0xff]  ;;  %1366 = vst [vmem:[%s2069_s17 + $0x660] sm:$0xff] %v854_v27  ;;  %1367 = vst [vmem:[%s2069_s17 + $0x668] sm:$0xff] %v855_v28  ;;  %v860_v39 = vmax.f32 %v348_v36, 0.0  ;;  %v861_v40 = vmax.f32 %v349_v37, 0.0  ;;  %v351_v42 = vld [vmem:[%s2054_s30 + $0x6a8] sm:$0xff] }
  0xa2   : > { %1368 = vst [vmem:[%s2069_s17 + $0x670] sm:$0xff] %v856_v29  ;;  %v862_v41 = vmax.f32 %v350_v38, 0.0  ;;  %v352_v43 = vld [vmem:[%s2054_s30 + $0x6b0] sm:$0xff]  ;;  %v353_v44 = vld [vmem:[%s2054_s30 + $0x6b8] sm:$0xff]  ;;  %1369 = vst [vmem:[%s2069_s17 + $0x678] sm:$0xff] %v857_v33  ;;  %v863_v45 = vmax.f32 %v351_v42, 0.0 }
  0xa3   : > { %1370 = vst [vmem:[%s2069_s17 + $0x680] sm:$0xff] %v858_v34  ;;  %1371 = vst [vmem:[%s2069_s17 + $0x688] sm:$0xff] %v859_v35  ;;  %v864_v46 = vmax.f32 %v352_v43, 0.0  ;;  %v865_v47 = vmax.f32 %v353_v44, 0.0  ;;  %v354_v48 = vld [vmem:[%s2054_s30 + $0x6c0] sm:$0xff]  ;;  %v355_v49 = vld [vmem:[%s2054_s30 + $0x6c8] sm:$0xff] }
  0xa4   : > { %v356_v50 = vld [vmem:[%s2054_s30 + $0x6d0] sm:$0xff]  ;;  %1372 = vst [vmem:[%s2069_s17 + $0x690] sm:$0xff] %v860_v39  ;;  %1373 = vst [vmem:[%s2069_s17 + $0x698] sm:$0xff] %v861_v40  ;;  %v866_v51 = vmax.f32 %v354_v48, 0.0  ;;  %v867_v52 = vmax.f32 %v355_v49, 0.0  ;;  %v357_v54 = vld [vmem:[%s2054_s30 + $0x6d8] sm:$0xff] }
  0xa5   : > { %1374 = vst [vmem:[%s2069_s17 + $0x6a0] sm:$0xff] %v862_v41  ;;  %v868_v53 = vmax.f32 %v356_v50, 0.0  ;;  %v358_v55 = vld [vmem:[%s2054_s30 + $0x6e0] sm:$0xff]  ;;  %v359_v56 = vld [vmem:[%s2054_s30 + $0x6e8] sm:$0xff]  ;;  %1375 = vst [vmem:[%s2069_s17 + $0x6a8] sm:$0xff] %v863_v45  ;;  %v869_v57 = vmax.f32 %v357_v54, 0.0 }
  0xa6   : > { %1376 = vst [vmem:[%s2069_s17 + $0x6b0] sm:$0xff] %v864_v46  ;;  %1377 = vst [vmem:[%s2069_s17 + $0x6b8] sm:$0xff] %v865_v47  ;;  %v870_v58 = vmax.f32 %v358_v55, 0.0  ;;  %v871_v59 = vmax.f32 %v359_v56, 0.0  ;;  %v360_v60 = vld [vmem:[%s2054_s30 + $0x6f0] sm:$0xff]  ;;  %v361_v61 = vld [vmem:[%s2054_s30 + $0x6f8] sm:$0xff] }
  0xa7   : > { %v362_v62 = vld [vmem:[%s2054_s30 + $0x700] sm:$0xff]  ;;  %1378 = vst [vmem:[%s2069_s17 + $0x6c0] sm:$0xff] %v866_v51  ;;  %1379 = vst [vmem:[%s2069_s17 + $0x6c8] sm:$0xff] %v867_v52  ;;  %v872_v63 = vmax.f32 %v360_v60, 0.0  ;;  %v873_v0 = vmax.f32 %v361_v61, 0.0  ;;  %v363_v2 = vld [vmem:[%s2054_s30 + $0x708] sm:$0xff] }
  0xa8   : > { %1380 = vst [vmem:[%s2069_s17 + $0x6d0] sm:$0xff] %v868_v53  ;;  %v874_v1 = vmax.f32 %v362_v62, 0.0  ;;  %v364_v3 = vld [vmem:[%s2054_s30 + $0x710] sm:$0xff]  ;;  %v365_v4 = vld [vmem:[%s2054_s30 + $0x718] sm:$0xff]  ;;  %1381 = vst [vmem:[%s2069_s17 + $0x6d8] sm:$0xff] %v869_v57  ;;  %v875_v5 = vmax.f32 %v363_v2, 0.0 }
  0xa9   : > { %1382 = vst [vmem:[%s2069_s17 + $0x6e0] sm:$0xff] %v870_v58  ;;  %1383 = vst [vmem:[%s2069_s17 + $0x6e8] sm:$0xff] %v871_v59  ;;  %v876_v6 = vmax.f32 %v364_v3, 0.0  ;;  %v877_v7 = vmax.f32 %v365_v4, 0.0  ;;  %v366_v8 = vld [vmem:[%s2054_s30 + $0x720] sm:$0xff]  ;;  %v367_v9 = vld [vmem:[%s2054_s30 + $0x728] sm:$0xff] }
  0xaa   : > { %v368_v10 = vld [vmem:[%s2054_s30 + $0x730] sm:$0xff]  ;;  %1384 = vst [vmem:[%s2069_s17 + $0x6f0] sm:$0xff] %v872_v63  ;;  %1385 = vst [vmem:[%s2069_s17 + $0x6f8] sm:$0xff] %v873_v0  ;;  %v878_v11 = vmax.f32 %v366_v8, 0.0  ;;  %v879_v12 = vmax.f32 %v367_v9, 0.0  ;;  %v369_v14 = vld [vmem:[%s2054_s30 + $0x738] sm:$0xff] }
  0xab   : > { %1386 = vst [vmem:[%s2069_s17 + $0x700] sm:$0xff] %v874_v1  ;;  %v880_v13 = vmax.f32 %v368_v10, 0.0  ;;  %v370_v15 = vld [vmem:[%s2054_s30 + $0x740] sm:$0xff]  ;;  %v371_v16 = vld [vmem:[%s2054_s30 + $0x748] sm:$0xff]  ;;  %1387 = vst [vmem:[%s2069_s17 + $0x708] sm:$0xff] %v875_v5  ;;  %v881_v17 = vmax.f32 %v369_v14, 0.0 }
  0xac   : > { %1388 = vst [vmem:[%s2069_s17 + $0x710] sm:$0xff] %v876_v6  ;;  %1389 = vst [vmem:[%s2069_s17 + $0x718] sm:$0xff] %v877_v7  ;;  %v882_v18 = vmax.f32 %v370_v15, 0.0  ;;  %v883_v19 = vmax.f32 %v371_v16, 0.0  ;;  %v372_v20 = vld [vmem:[%s2054_s30 + $0x750] sm:$0xff]  ;;  %v373_v21 = vld [vmem:[%s2054_s30 + $0x758] sm:$0xff] }
  0xad   : > { %v374_v22 = vld [vmem:[%s2054_s30 + $0x760] sm:$0xff]  ;;  %1390 = vst [vmem:[%s2069_s17 + $0x720] sm:$0xff] %v878_v11  ;;  %1391 = vst [vmem:[%s2069_s17 + $0x728] sm:$0xff] %v879_v12  ;;  %v884_v23 = vmax.f32 %v372_v20, 0.0  ;;  %v885_v24 = vmax.f32 %v373_v21, 0.0  ;;  %v375_v26 = vld [vmem:[%s2054_s30 + $0x768] sm:$0xff] }
  0xae   : > { %1392 = vst [vmem:[%s2069_s17 + $0x730] sm:$0xff] %v880_v13  ;;  %v886_v25 = vmax.f32 %v374_v22, 0.0  ;;  %v376_v27 = vld [vmem:[%s2054_s30 + $0x770] sm:$0xff]  ;;  %v377_v28 = vld [vmem:[%s2054_s30 + $0x778] sm:$0xff]  ;;  %1393 = vst [vmem:[%s2069_s17 + $0x738] sm:$0xff] %v881_v17  ;;  %v887_v29 = vmax.f32 %v375_v26, 0.0 }
  0xaf   : > { %1394 = vst [vmem:[%s2069_s17 + $0x740] sm:$0xff] %v882_v18  ;;  %1395 = vst [vmem:[%s2069_s17 + $0x748] sm:$0xff] %v883_v19  ;;  %v888_v30 = vmax.f32 %v376_v27, 0.0  ;;  %v889_v31 = vmax.f32 %v377_v28, 0.0  ;;  %v378_v32 = vld [vmem:[%s2054_s30 + $0x780] sm:$0xff]  ;;  %v379_v33 = vld [vmem:[%s2054_s30 + $0x788] sm:$0xff] }
  0xb0   : > { %v380_v34 = vld [vmem:[%s2054_s30 + $0x790] sm:$0xff]  ;;  %1396 = vst [vmem:[%s2069_s17 + $0x750] sm:$0xff] %v884_v23  ;;  %1397 = vst [vmem:[%s2069_s17 + $0x758] sm:$0xff] %v885_v24  ;;  %v890_v35 = vmax.f32 %v378_v32, 0.0  ;;  %v891_v36 = vmax.f32 %v379_v33, 0.0  ;;  %v381_v38 = vld [vmem:[%s2054_s30 + $0x798] sm:$0xff] }
  0xb1   : > { %1398 = vst [vmem:[%s2069_s17 + $0x760] sm:$0xff] %v886_v25  ;;  %v892_v37 = vmax.f32 %v380_v34, 0.0  ;;  %v382_v39 = vld [vmem:[%s2054_s30 + $0x7a0] sm:$0xff]  ;;  %v383_v40 = vld [vmem:[%s2054_s30 + $0x7a8] sm:$0xff]  ;;  %1399 = vst [vmem:[%s2069_s17 + $0x768] sm:$0xff] %v887_v29  ;;  %v893_v41 = vmax.f32 %v381_v38, 0.0 }
  0xb2   : > { %1400 = vst [vmem:[%s2069_s17 + $0x770] sm:$0xff] %v888_v30  ;;  %1401 = vst [vmem:[%s2069_s17 + $0x778] sm:$0xff] %v889_v31  ;;  %v894_v42 = vmax.f32 %v382_v39, 0.0  ;;  %v895_v43 = vmax.f32 %v383_v40, 0.0  ;;  %v384_v44 = vld [vmem:[%s2054_s30 + $0x7b0] sm:$0xff]  ;;  %v385_v45 = vld [vmem:[%s2054_s30 + $0x7b8] sm:$0xff] }
  0xb3   : > { %v386_v46 = vld [vmem:[%s2054_s30 + $0x7c0] sm:$0xff]  ;;  %1402 = vst [vmem:[%s2069_s17 + $0x780] sm:$0xff] %v890_v35  ;;  %1403 = vst [vmem:[%s2069_s17 + $0x788] sm:$0xff] %v891_v36  ;;  %v896_v47 = vmax.f32 %v384_v44, 0.0  ;;  %v897_v48 = vmax.f32 %v385_v45, 0.0  ;;  %v387_v50 = vld [vmem:[%s2054_s30 + $0x7c8] sm:$0xff] }
  0xb4   : > { %1404 = vst [vmem:[%s2069_s17 + $0x790] sm:$0xff] %v892_v37  ;;  %v898_v49 = vmax.f32 %v386_v46, 0.0  ;;  %v388_v51 = vld [vmem:[%s2054_s30 + $0x7d0] sm:$0xff]  ;;  %v389_v52 = vld [vmem:[%s2054_s30 + $0x7d8] sm:$0xff]  ;;  %1405 = vst [vmem:[%s2069_s17 + $0x798] sm:$0xff] %v893_v41  ;;  %v899_v53 = vmax.f32 %v387_v50, 0.0 }
  0xb5   : > { %1406 = vst [vmem:[%s2069_s17 + $0x7a0] sm:$0xff] %v894_v42  ;;  %1407 = vst [vmem:[%s2069_s17 + $0x7a8] sm:$0xff] %v895_v43  ;;  %v900_v54 = vmax.f32 %v388_v51, 0.0  ;;  %v901_v55 = vmax.f32 %v389_v52, 0.0  ;;  %v390_v56 = vld [vmem:[%s2054_s30 + $0x7e0] sm:$0xff]  ;;  %v391_v57 = vld [vmem:[%s2054_s30 + $0x7e8] sm:$0xff] }
  0xb6   : > { %v392_v58 = vld [vmem:[%s2054_s30 + $0x7f0] sm:$0xff]  ;;  %1408 = vst [vmem:[%s2069_s17 + $0x7b0] sm:$0xff] %v896_v47  ;;  %1409 = vst [vmem:[%s2069_s17 + $0x7b8] sm:$0xff] %v897_v48  ;;  %v902_v59 = vmax.f32 %v390_v56, 0.0  ;;  %v903_v60 = vmax.f32 %v391_v57, 0.0  ;;  %v393_v62 = vld [vmem:[%s2054_s30 + $0x7f8] sm:$0xff] }
  0xb7   : > { %1410 = vst [vmem:[%s2069_s17 + $0x7c0] sm:$0xff] %v898_v49  ;;  %v904_v61 = vmax.f32 %v392_v58, 0.0  ;;  %v394_v63 = vld [vmem:[%s2054_s30 + $0x800] sm:$0xff]  ;;  %v395_v0 = vld [vmem:[%s2054_s30 + $0x808] sm:$0xff]  ;;  %1411 = vst [vmem:[%s2069_s17 + $0x7c8] sm:$0xff] %v899_v53  ;;  %v905_v1 = vmax.f32 %v393_v62, 0.0 }
  0xb8   : > { %1412 = vst [vmem:[%s2069_s17 + $0x7d0] sm:$0xff] %v900_v54  ;;  %1413 = vst [vmem:[%s2069_s17 + $0x7d8] sm:$0xff] %v901_v55  ;;  %v906_v2 = vmax.f32 %v394_v63, 0.0  ;;  %v907_v3 = vmax.f32 %v395_v0, 0.0  ;;  %v396_v4 = vld [vmem:[%s2054_s30 + $0x810] sm:$0xff]  ;;  %v397_v5 = vld [vmem:[%s2054_s30 + $0x818] sm:$0xff] }
  0xb9   : > { %v398_v6 = vld [vmem:[%s2054_s30 + $0x820] sm:$0xff]  ;;  %1414 = vst [vmem:[%s2069_s17 + $0x7e0] sm:$0xff] %v902_v59  ;;  %1415 = vst [vmem:[%s2069_s17 + $0x7e8] sm:$0xff] %v903_v60  ;;  %v908_v7 = vmax.f32 %v396_v4, 0.0  ;;  %v909_v8 = vmax.f32 %v397_v5, 0.0  ;;  %v399_v10 = vld [vmem:[%s2054_s30 + $0x828] sm:$0xff] }
  0xba   : > { %1416 = vst [vmem:[%s2069_s17 + $0x7f0] sm:$0xff] %v904_v61  ;;  %v910_v9 = vmax.f32 %v398_v6, 0.0  ;;  %v400_v11 = vld [vmem:[%s2054_s30 + $0x830] sm:$0xff]  ;;  %v401_v12 = vld [vmem:[%s2054_s30 + $0x838] sm:$0xff]  ;;  %1417 = vst [vmem:[%s2069_s17 + $0x7f8] sm:$0xff] %v905_v1  ;;  %v911_v13 = vmax.f32 %v399_v10, 0.0 }
  0xbb   : > { %1418 = vst [vmem:[%s2069_s17 + $0x800] sm:$0xff] %v906_v2  ;;  %1419 = vst [vmem:[%s2069_s17 + $0x808] sm:$0xff] %v907_v3  ;;  %v912_v14 = vmax.f32 %v400_v11, 0.0  ;;  %v913_v15 = vmax.f32 %v401_v12, 0.0  ;;  %v402_v16 = vld [vmem:[%s2054_s30 + $0x840] sm:$0xff]  ;;  %v403_v17 = vld [vmem:[%s2054_s30 + $0x848] sm:$0xff] }
  0xbc   : > { %v404_v18 = vld [vmem:[%s2054_s30 + $0x850] sm:$0xff]  ;;  %1420 = vst [vmem:[%s2069_s17 + $0x810] sm:$0xff] %v908_v7  ;;  %1421 = vst [vmem:[%s2069_s17 + $0x818] sm:$0xff] %v909_v8  ;;  %v914_v19 = vmax.f32 %v402_v16, 0.0  ;;  %v915_v20 = vmax.f32 %v403_v17, 0.0  ;;  %v405_v22 = vld [vmem:[%s2054_s30 + $0x858] sm:$0xff] }
  0xbd   : > { %1422 = vst [vmem:[%s2069_s17 + $0x820] sm:$0xff] %v910_v9  ;;  %v916_v21 = vmax.f32 %v404_v18, 0.0  ;;  %v406_v23 = vld [vmem:[%s2054_s30 + $0x860] sm:$0xff]  ;;  %v407_v24 = vld [vmem:[%s2054_s30 + $0x868] sm:$0xff]  ;;  %1423 = vst [vmem:[%s2069_s17 + $0x828] sm:$0xff] %v911_v13  ;;  %v917_v25 = vmax.f32 %v405_v22, 0.0 }
  0xbe   : > { %1424 = vst [vmem:[%s2069_s17 + $0x830] sm:$0xff] %v912_v14  ;;  %1425 = vst [vmem:[%s2069_s17 + $0x838] sm:$0xff] %v913_v15  ;;  %v918_v26 = vmax.f32 %v406_v23, 0.0  ;;  %v919_v27 = vmax.f32 %v407_v24, 0.0  ;;  %v408_v28 = vld [vmem:[%s2054_s30 + $0x870] sm:$0xff]  ;;  %v409_v29 = vld [vmem:[%s2054_s30 + $0x878] sm:$0xff] }
  0xbf   : > { %v410_v30 = vld [vmem:[%s2054_s30 + $0x880] sm:$0xff]  ;;  %1426 = vst [vmem:[%s2069_s17 + $0x840] sm:$0xff] %v914_v19  ;;  %1427 = vst [vmem:[%s2069_s17 + $0x848] sm:$0xff] %v915_v20  ;;  %v920_v31 = vmax.f32 %v408_v28, 0.0  ;;  %v921_v32 = vmax.f32 %v409_v29, 0.0  ;;  %v411_v34 = vld [vmem:[%s2054_s30 + $0x888] sm:$0xff] }
  0xc0   : > { %1428 = vst [vmem:[%s2069_s17 + $0x850] sm:$0xff] %v916_v21  ;;  %v922_v33 = vmax.f32 %v410_v30, 0.0  ;;  %v412_v35 = vld [vmem:[%s2054_s30 + $0x890] sm:$0xff]  ;;  %v413_v36 = vld [vmem:[%s2054_s30 + $0x898] sm:$0xff]  ;;  %1429 = vst [vmem:[%s2069_s17 + $0x858] sm:$0xff] %v917_v25  ;;  %v923_v37 = vmax.f32 %v411_v34, 0.0 }
  0xc1   : > { %1430 = vst [vmem:[%s2069_s17 + $0x860] sm:$0xff] %v918_v26  ;;  %1431 = vst [vmem:[%s2069_s17 + $0x868] sm:$0xff] %v919_v27  ;;  %v924_v38 = vmax.f32 %v412_v35, 0.0  ;;  %v925_v39 = vmax.f32 %v413_v36, 0.0  ;;  %v414_v40 = vld [vmem:[%s2054_s30 + $0x8a0] sm:$0xff]  ;;  %v415_v41 = vld [vmem:[%s2054_s30 + $0x8a8] sm:$0xff] }
  0xc2   : > { %v416_v42 = vld [vmem:[%s2054_s30 + $0x8b0] sm:$0xff]  ;;  %1432 = vst [vmem:[%s2069_s17 + $0x870] sm:$0xff] %v920_v31  ;;  %1433 = vst [vmem:[%s2069_s17 + $0x878] sm:$0xff] %v921_v32  ;;  %v926_v43 = vmax.f32 %v414_v40, 0.0  ;;  %v927_v44 = vmax.f32 %v415_v41, 0.0  ;;  %v417_v46 = vld [vmem:[%s2054_s30 + $0x8b8] sm:$0xff] }
  0xc3   : > { %1434 = vst [vmem:[%s2069_s17 + $0x880] sm:$0xff] %v922_v33  ;;  %v928_v45 = vmax.f32 %v416_v42, 0.0  ;;  %v418_v47 = vld [vmem:[%s2054_s30 + $0x8c0] sm:$0xff]  ;;  %v419_v48 = vld [vmem:[%s2054_s30 + $0x8c8] sm:$0xff]  ;;  %1435 = vst [vmem:[%s2069_s17 + $0x888] sm:$0xff] %v923_v37  ;;  %v929_v49 = vmax.f32 %v417_v46, 0.0 }
  0xc4   : > { %1436 = vst [vmem:[%s2069_s17 + $0x890] sm:$0xff] %v924_v38  ;;  %1437 = vst [vmem:[%s2069_s17 + $0x898] sm:$0xff] %v925_v39  ;;  %v930_v50 = vmax.f32 %v418_v47, 0.0  ;;  %v931_v51 = vmax.f32 %v419_v48, 0.0  ;;  %v420_v52 = vld [vmem:[%s2054_s30 + $0x8d0] sm:$0xff]  ;;  %v421_v53 = vld [vmem:[%s2054_s30 + $0x8d8] sm:$0xff] }
  0xc5   : > { %v422_v54 = vld [vmem:[%s2054_s30 + $0x8e0] sm:$0xff]  ;;  %1438 = vst [vmem:[%s2069_s17 + $0x8a0] sm:$0xff] %v926_v43  ;;  %1439 = vst [vmem:[%s2069_s17 + $0x8a8] sm:$0xff] %v927_v44  ;;  %v932_v55 = vmax.f32 %v420_v52, 0.0  ;;  %v933_v56 = vmax.f32 %v421_v53, 0.0  ;;  %v423_v58 = vld [vmem:[%s2054_s30 + $0x8e8] sm:$0xff] }
  0xc6   : > { %1440 = vst [vmem:[%s2069_s17 + $0x8b0] sm:$0xff] %v928_v45  ;;  %v934_v57 = vmax.f32 %v422_v54, 0.0  ;;  %v424_v59 = vld [vmem:[%s2054_s30 + $0x8f0] sm:$0xff]  ;;  %v425_v60 = vld [vmem:[%s2054_s30 + $0x8f8] sm:$0xff]  ;;  %1441 = vst [vmem:[%s2069_s17 + $0x8b8] sm:$0xff] %v929_v49  ;;  %v935_v61 = vmax.f32 %v423_v58, 0.0 }
  0xc7   : > { %1442 = vst [vmem:[%s2069_s17 + $0x8c0] sm:$0xff] %v930_v50  ;;  %1443 = vst [vmem:[%s2069_s17 + $0x8c8] sm:$0xff] %v931_v51  ;;  %v936_v62 = vmax.f32 %v424_v59, 0.0  ;;  %v937_v63 = vmax.f32 %v425_v60, 0.0  ;;  %v426_v0 = vld [vmem:[%s2054_s30 + $0x900] sm:$0xff]  ;;  %v427_v1 = vld [vmem:[%s2054_s30 + $0x908] sm:$0xff] }
  0xc8   : > { %v428_v2 = vld [vmem:[%s2054_s30 + $0x910] sm:$0xff]  ;;  %1444 = vst [vmem:[%s2069_s17 + $0x8d0] sm:$0xff] %v932_v55  ;;  %1445 = vst [vmem:[%s2069_s17 + $0x8d8] sm:$0xff] %v933_v56  ;;  %v938_v3 = vmax.f32 %v426_v0, 0.0  ;;  %v939_v4 = vmax.f32 %v427_v1, 0.0  ;;  %v429_v6 = vld [vmem:[%s2054_s30 + $0x918] sm:$0xff] }
  0xc9   : > { %1446 = vst [vmem:[%s2069_s17 + $0x8e0] sm:$0xff] %v934_v57  ;;  %v940_v5 = vmax.f32 %v428_v2, 0.0  ;;  %v430_v7 = vld [vmem:[%s2054_s30 + $0x920] sm:$0xff]  ;;  %v431_v8 = vld [vmem:[%s2054_s30 + $0x928] sm:$0xff]  ;;  %1447 = vst [vmem:[%s2069_s17 + $0x8e8] sm:$0xff] %v935_v61  ;;  %v941_v9 = vmax.f32 %v429_v6, 0.0 }
  0xca   : > { %1448 = vst [vmem:[%s2069_s17 + $0x8f0] sm:$0xff] %v936_v62  ;;  %1449 = vst [vmem:[%s2069_s17 + $0x8f8] sm:$0xff] %v937_v63  ;;  %v942_v10 = vmax.f32 %v430_v7, 0.0  ;;  %v943_v11 = vmax.f32 %v431_v8, 0.0  ;;  %v432_v12 = vld [vmem:[%s2054_s30 + $0x930] sm:$0xff]  ;;  %v433_v13 = vld [vmem:[%s2054_s30 + $0x938] sm:$0xff] }
  0xcb   : > { %v434_v14 = vld [vmem:[%s2054_s30 + $0x940] sm:$0xff]  ;;  %1450 = vst [vmem:[%s2069_s17 + $0x900] sm:$0xff] %v938_v3  ;;  %1451 = vst [vmem:[%s2069_s17 + $0x908] sm:$0xff] %v939_v4  ;;  %v944_v15 = vmax.f32 %v432_v12, 0.0  ;;  %v945_v16 = vmax.f32 %v433_v13, 0.0  ;;  %v435_v18 = vld [vmem:[%s2054_s30 + $0x948] sm:$0xff] }
  0xcc   : > { %1452 = vst [vmem:[%s2069_s17 + $0x910] sm:$0xff] %v940_v5  ;;  %v946_v17 = vmax.f32 %v434_v14, 0.0  ;;  %v436_v19 = vld [vmem:[%s2054_s30 + $0x950] sm:$0xff]  ;;  %v437_v20 = vld [vmem:[%s2054_s30 + $0x958] sm:$0xff]  ;;  %1453 = vst [vmem:[%s2069_s17 + $0x918] sm:$0xff] %v941_v9  ;;  %v947_v21 = vmax.f32 %v435_v18, 0.0 }
  0xcd   : > { %1454 = vst [vmem:[%s2069_s17 + $0x920] sm:$0xff] %v942_v10  ;;  %1455 = vst [vmem:[%s2069_s17 + $0x928] sm:$0xff] %v943_v11  ;;  %v948_v22 = vmax.f32 %v436_v19, 0.0  ;;  %v949_v23 = vmax.f32 %v437_v20, 0.0  ;;  %v438_v24 = vld [vmem:[%s2054_s30 + $0x960] sm:$0xff]  ;;  %v439_v25 = vld [vmem:[%s2054_s30 + $0x968] sm:$0xff] }
  0xce   : > { %v440_v26 = vld [vmem:[%s2054_s30 + $0x970] sm:$0xff]  ;;  %1456 = vst [vmem:[%s2069_s17 + $0x930] sm:$0xff] %v944_v15  ;;  %1457 = vst [vmem:[%s2069_s17 + $0x938] sm:$0xff] %v945_v16  ;;  %v950_v27 = vmax.f32 %v438_v24, 0.0  ;;  %v951_v28 = vmax.f32 %v439_v25, 0.0  ;;  %v441_v30 = vld [vmem:[%s2054_s30 + $0x978] sm:$0xff] }
  0xcf   : > { %1458 = vst [vmem:[%s2069_s17 + $0x940] sm:$0xff] %v946_v17  ;;  %v952_v29 = vmax.f32 %v440_v26, 0.0  ;;  %v442_v31 = vld [vmem:[%s2054_s30 + $0x980] sm:$0xff]  ;;  %v443_v32 = vld [vmem:[%s2054_s30 + $0x988] sm:$0xff]  ;;  %1459 = vst [vmem:[%s2069_s17 + $0x948] sm:$0xff] %v947_v21  ;;  %v953_v33 = vmax.f32 %v441_v30, 0.0 }
  0xd0   : > { %1460 = vst [vmem:[%s2069_s17 + $0x950] sm:$0xff] %v948_v22  ;;  %1461 = vst [vmem:[%s2069_s17 + $0x958] sm:$0xff] %v949_v23  ;;  %v954_v34 = vmax.f32 %v442_v31, 0.0  ;;  %v955_v35 = vmax.f32 %v443_v32, 0.0  ;;  %v444_v36 = vld [vmem:[%s2054_s30 + $0x990] sm:$0xff]  ;;  %v445_v37 = vld [vmem:[%s2054_s30 + $0x998] sm:$0xff] }
  0xd1   : > { %v446_v38 = vld [vmem:[%s2054_s30 + $0x9a0] sm:$0xff]  ;;  %1462 = vst [vmem:[%s2069_s17 + $0x960] sm:$0xff] %v950_v27  ;;  %1463 = vst [vmem:[%s2069_s17 + $0x968] sm:$0xff] %v951_v28  ;;  %v956_v39 = vmax.f32 %v444_v36, 0.0  ;;  %v957_v40 = vmax.f32 %v445_v37, 0.0  ;;  %v447_v42 = vld [vmem:[%s2054_s30 + $0x9a8] sm:$0xff] }
  0xd2   : > { %1464 = vst [vmem:[%s2069_s17 + $0x970] sm:$0xff] %v952_v29  ;;  %v958_v41 = vmax.f32 %v446_v38, 0.0  ;;  %v448_v43 = vld [vmem:[%s2054_s30 + $0x9b0] sm:$0xff]  ;;  %v449_v44 = vld [vmem:[%s2054_s30 + $0x9b8] sm:$0xff]  ;;  %1465 = vst [vmem:[%s2069_s17 + $0x978] sm:$0xff] %v953_v33  ;;  %v959_v45 = vmax.f32 %v447_v42, 0.0 }
  0xd3   : > { %1466 = vst [vmem:[%s2069_s17 + $0x980] sm:$0xff] %v954_v34  ;;  %1467 = vst [vmem:[%s2069_s17 + $0x988] sm:$0xff] %v955_v35  ;;  %v960_v46 = vmax.f32 %v448_v43, 0.0  ;;  %v961_v47 = vmax.f32 %v449_v44, 0.0  ;;  %v450_v48 = vld [vmem:[%s2054_s30 + $0x9c0] sm:$0xff]  ;;  %v451_v49 = vld [vmem:[%s2054_s30 + $0x9c8] sm:$0xff] }
  0xd4   : > { %v452_v50 = vld [vmem:[%s2054_s30 + $0x9d0] sm:$0xff]  ;;  %1468 = vst [vmem:[%s2069_s17 + $0x990] sm:$0xff] %v956_v39  ;;  %1469 = vst [vmem:[%s2069_s17 + $0x998] sm:$0xff] %v957_v40  ;;  %v962_v51 = vmax.f32 %v450_v48, 0.0  ;;  %v963_v52 = vmax.f32 %v451_v49, 0.0  ;;  %v453_v54 = vld [vmem:[%s2054_s30 + $0x9d8] sm:$0xff] }
  0xd5   : > { %1470 = vst [vmem:[%s2069_s17 + $0x9a0] sm:$0xff] %v958_v41  ;;  %v964_v53 = vmax.f32 %v452_v50, 0.0  ;;  %v454_v55 = vld [vmem:[%s2054_s30 + $0x9e0] sm:$0xff]  ;;  %v455_v56 = vld [vmem:[%s2054_s30 + $0x9e8] sm:$0xff]  ;;  %1471 = vst [vmem:[%s2069_s17 + $0x9a8] sm:$0xff] %v959_v45  ;;  %v965_v57 = vmax.f32 %v453_v54, 0.0 }
  0xd6   : > { %1472 = vst [vmem:[%s2069_s17 + $0x9b0] sm:$0xff] %v960_v46  ;;  %1473 = vst [vmem:[%s2069_s17 + $0x9b8] sm:$0xff] %v961_v47  ;;  %v966_v58 = vmax.f32 %v454_v55, 0.0  ;;  %v967_v59 = vmax.f32 %v455_v56, 0.0  ;;  %v456_v60 = vld [vmem:[%s2054_s30 + $0x9f0] sm:$0xff]  ;;  %v457_v61 = vld [vmem:[%s2054_s30 + $0x9f8] sm:$0xff] }
  0xd7   : > { %v458_v62 = vld [vmem:[%s2054_s30 + $0xa00] sm:$0xff]  ;;  %1474 = vst [vmem:[%s2069_s17 + $0x9c0] sm:$0xff] %v962_v51  ;;  %1475 = vst [vmem:[%s2069_s17 + $0x9c8] sm:$0xff] %v963_v52  ;;  %v968_v63 = vmax.f32 %v456_v60, 0.0  ;;  %v969_v0 = vmax.f32 %v457_v61, 0.0  ;;  %v459_v2 = vld [vmem:[%s2054_s30 + $0xa08] sm:$0xff] }
  0xd8   : > { %1476 = vst [vmem:[%s2069_s17 + $0x9d0] sm:$0xff] %v964_v53  ;;  %v970_v1 = vmax.f32 %v458_v62, 0.0  ;;  %v460_v3 = vld [vmem:[%s2054_s30 + $0xa10] sm:$0xff]  ;;  %v461_v4 = vld [vmem:[%s2054_s30 + $0xa18] sm:$0xff]  ;;  %1477 = vst [vmem:[%s2069_s17 + $0x9d8] sm:$0xff] %v965_v57  ;;  %v971_v5 = vmax.f32 %v459_v2, 0.0 }
  0xd9   : > { %1478 = vst [vmem:[%s2069_s17 + $0x9e0] sm:$0xff] %v966_v58  ;;  %1479 = vst [vmem:[%s2069_s17 + $0x9e8] sm:$0xff] %v967_v59  ;;  %v972_v6 = vmax.f32 %v460_v3, 0.0  ;;  %v973_v7 = vmax.f32 %v461_v4, 0.0  ;;  %v462_v8 = vld [vmem:[%s2054_s30 + $0xa20] sm:$0xff]  ;;  %v463_v9 = vld [vmem:[%s2054_s30 + $0xa28] sm:$0xff] }
  0xda   : > { %v464_v10 = vld [vmem:[%s2054_s30 + $0xa30] sm:$0xff]  ;;  %1480 = vst [vmem:[%s2069_s17 + $0x9f0] sm:$0xff] %v968_v63  ;;  %1481 = vst [vmem:[%s2069_s17 + $0x9f8] sm:$0xff] %v969_v0  ;;  %v974_v11 = vmax.f32 %v462_v8, 0.0  ;;  %v975_v12 = vmax.f32 %v463_v9, 0.0  ;;  %v465_v14 = vld [vmem:[%s2054_s30 + $0xa38] sm:$0xff] }
  0xdb   : > { %1482 = vst [vmem:[%s2069_s17 + $0xa00] sm:$0xff] %v970_v1  ;;  %v976_v13 = vmax.f32 %v464_v10, 0.0  ;;  %v466_v15 = vld [vmem:[%s2054_s30 + $0xa40] sm:$0xff]  ;;  %v467_v16 = vld [vmem:[%s2054_s30 + $0xa48] sm:$0xff]  ;;  %1483 = vst [vmem:[%s2069_s17 + $0xa08] sm:$0xff] %v971_v5  ;;  %v977_v17 = vmax.f32 %v465_v14, 0.0 }
  0xdc   : > { %1484 = vst [vmem:[%s2069_s17 + $0xa10] sm:$0xff] %v972_v6  ;;  %1485 = vst [vmem:[%s2069_s17 + $0xa18] sm:$0xff] %v973_v7  ;;  %v978_v18 = vmax.f32 %v466_v15, 0.0  ;;  %v979_v19 = vmax.f32 %v467_v16, 0.0  ;;  %v468_v20 = vld [vmem:[%s2054_s30 + $0xa50] sm:$0xff]  ;;  %v469_v21 = vld [vmem:[%s2054_s30 + $0xa58] sm:$0xff] }
  0xdd   : > { %v470_v22 = vld [vmem:[%s2054_s30 + $0xa60] sm:$0xff]  ;;  %1486 = vst [vmem:[%s2069_s17 + $0xa20] sm:$0xff] %v974_v11  ;;  %1487 = vst [vmem:[%s2069_s17 + $0xa28] sm:$0xff] %v975_v12  ;;  %v980_v23 = vmax.f32 %v468_v20, 0.0  ;;  %v981_v24 = vmax.f32 %v469_v21, 0.0  ;;  %v471_v26 = vld [vmem:[%s2054_s30 + $0xa68] sm:$0xff] }
  0xde   : > { %1488 = vst [vmem:[%s2069_s17 + $0xa30] sm:$0xff] %v976_v13  ;;  %v982_v25 = vmax.f32 %v470_v22, 0.0  ;;  %v472_v27 = vld [vmem:[%s2054_s30 + $0xa70] sm:$0xff]  ;;  %v473_v28 = vld [vmem:[%s2054_s30 + $0xa78] sm:$0xff]  ;;  %1489 = vst [vmem:[%s2069_s17 + $0xa38] sm:$0xff] %v977_v17  ;;  %v983_v29 = vmax.f32 %v471_v26, 0.0 }
  0xdf   : > { %1490 = vst [vmem:[%s2069_s17 + $0xa40] sm:$0xff] %v978_v18  ;;  %1491 = vst [vmem:[%s2069_s17 + $0xa48] sm:$0xff] %v979_v19  ;;  %v984_v30 = vmax.f32 %v472_v27, 0.0  ;;  %v985_v31 = vmax.f32 %v473_v28, 0.0  ;;  %v474_v32 = vld [vmem:[%s2054_s30 + $0xa80] sm:$0xff]  ;;  %v475_v33 = vld [vmem:[%s2054_s30 + $0xa88] sm:$0xff] }
  0xe0   : > { %v476_v34 = vld [vmem:[%s2054_s30 + $0xa90] sm:$0xff]  ;;  %1492 = vst [vmem:[%s2069_s17 + $0xa50] sm:$0xff] %v980_v23  ;;  %1493 = vst [vmem:[%s2069_s17 + $0xa58] sm:$0xff] %v981_v24  ;;  %v986_v35 = vmax.f32 %v474_v32, 0.0  ;;  %v987_v36 = vmax.f32 %v475_v33, 0.0  ;;  %v477_v38 = vld [vmem:[%s2054_s30 + $0xa98] sm:$0xff] }
  0xe1   : > { %1494 = vst [vmem:[%s2069_s17 + $0xa60] sm:$0xff] %v982_v25  ;;  %v988_v37 = vmax.f32 %v476_v34, 0.0  ;;  %v478_v39 = vld [vmem:[%s2054_s30 + $0xaa0] sm:$0xff]  ;;  %v479_v40 = vld [vmem:[%s2054_s30 + $0xaa8] sm:$0xff]  ;;  %1495 = vst [vmem:[%s2069_s17 + $0xa68] sm:$0xff] %v983_v29  ;;  %v989_v41 = vmax.f32 %v477_v38, 0.0 }
  0xe2   : > { %1496 = vst [vmem:[%s2069_s17 + $0xa70] sm:$0xff] %v984_v30  ;;  %1497 = vst [vmem:[%s2069_s17 + $0xa78] sm:$0xff] %v985_v31  ;;  %v990_v42 = vmax.f32 %v478_v39, 0.0  ;;  %v991_v43 = vmax.f32 %v479_v40, 0.0  ;;  %v480_v44 = vld [vmem:[%s2054_s30 + $0xab0] sm:$0xff]  ;;  %v481_v45 = vld [vmem:[%s2054_s30 + $0xab8] sm:$0xff] }
  0xe3   : > { %v482_v46 = vld [vmem:[%s2054_s30 + $0xac0] sm:$0xff]  ;;  %1498 = vst [vmem:[%s2069_s17 + $0xa80] sm:$0xff] %v986_v35  ;;  %1499 = vst [vmem:[%s2069_s17 + $0xa88] sm:$0xff] %v987_v36  ;;  %v992_v47 = vmax.f32 %v480_v44, 0.0  ;;  %v993_v48 = vmax.f32 %v481_v45, 0.0  ;;  %v483_v50 = vld [vmem:[%s2054_s30 + $0xac8] sm:$0xff] }
  0xe4   : > { %1500 = vst [vmem:[%s2069_s17 + $0xa90] sm:$0xff] %v988_v37  ;;  %v994_v49 = vmax.f32 %v482_v46, 0.0  ;;  %v484_v51 = vld [vmem:[%s2054_s30 + $0xad0] sm:$0xff]  ;;  %v485_v52 = vld [vmem:[%s2054_s30 + $0xad8] sm:$0xff]  ;;  %1501 = vst [vmem:[%s2069_s17 + $0xa98] sm:$0xff] %v989_v41  ;;  %v995_v53 = vmax.f32 %v483_v50, 0.0 }
  0xe5   : > { %1502 = vst [vmem:[%s2069_s17 + $0xaa0] sm:$0xff] %v990_v42  ;;  %1503 = vst [vmem:[%s2069_s17 + $0xaa8] sm:$0xff] %v991_v43  ;;  %v996_v54 = vmax.f32 %v484_v51, 0.0  ;;  %v997_v55 = vmax.f32 %v485_v52, 0.0  ;;  %v486_v56 = vld [vmem:[%s2054_s30 + $0xae0] sm:$0xff]  ;;  %v487_v57 = vld [vmem:[%s2054_s30 + $0xae8] sm:$0xff] }
  0xe6   : > { %v488_v58 = vld [vmem:[%s2054_s30 + $0xaf0] sm:$0xff]  ;;  %1504 = vst [vmem:[%s2069_s17 + $0xab0] sm:$0xff] %v992_v47  ;;  %1505 = vst [vmem:[%s2069_s17 + $0xab8] sm:$0xff] %v993_v48  ;;  %v998_v59 = vmax.f32 %v486_v56, 0.0  ;;  %v999_v60 = vmax.f32 %v487_v57, 0.0  ;;  %v489_v62 = vld [vmem:[%s2054_s30 + $0xaf8] sm:$0xff] }
  0xe7   : > { %1506 = vst [vmem:[%s2069_s17 + $0xac0] sm:$0xff] %v994_v49  ;;  %v1000_v61 = vmax.f32 %v488_v58, 0.0  ;;  %v490_v63 = vld [vmem:[%s2054_s30 + $0xb00] sm:$0xff]  ;;  %v491_v0 = vld [vmem:[%s2054_s30 + $0xb08] sm:$0xff]  ;;  %1507 = vst [vmem:[%s2069_s17 + $0xac8] sm:$0xff] %v995_v53  ;;  %v1001_v1 = vmax.f32 %v489_v62, 0.0 }
  0xe8   : > { %1508 = vst [vmem:[%s2069_s17 + $0xad0] sm:$0xff] %v996_v54  ;;  %1509 = vst [vmem:[%s2069_s17 + $0xad8] sm:$0xff] %v997_v55  ;;  %v1002_v2 = vmax.f32 %v490_v63, 0.0  ;;  %v1003_v3 = vmax.f32 %v491_v0, 0.0  ;;  %v492_v4 = vld [vmem:[%s2054_s30 + $0xb10] sm:$0xff]  ;;  %v493_v5 = vld [vmem:[%s2054_s30 + $0xb18] sm:$0xff] }
  0xe9   : > { %v494_v6 = vld [vmem:[%s2054_s30 + $0xb20] sm:$0xff]  ;;  %1510 = vst [vmem:[%s2069_s17 + $0xae0] sm:$0xff] %v998_v59  ;;  %1511 = vst [vmem:[%s2069_s17 + $0xae8] sm:$0xff] %v999_v60  ;;  %v1004_v7 = vmax.f32 %v492_v4, 0.0  ;;  %v1005_v8 = vmax.f32 %v493_v5, 0.0  ;;  %v495_v10 = vld [vmem:[%s2054_s30 + $0xb28] sm:$0xff] }
  0xea   : > { %1512 = vst [vmem:[%s2069_s17 + $0xaf0] sm:$0xff] %v1000_v61  ;;  %v1006_v9 = vmax.f32 %v494_v6, 0.0  ;;  %v496_v11 = vld [vmem:[%s2054_s30 + $0xb30] sm:$0xff]  ;;  %v497_v12 = vld [vmem:[%s2054_s30 + $0xb38] sm:$0xff]  ;;  %1513 = vst [vmem:[%s2069_s17 + $0xaf8] sm:$0xff] %v1001_v1  ;;  %v1007_v13 = vmax.f32 %v495_v10, 0.0 }
  0xeb   : > { %1514 = vst [vmem:[%s2069_s17 + $0xb00] sm:$0xff] %v1002_v2  ;;  %1515 = vst [vmem:[%s2069_s17 + $0xb08] sm:$0xff] %v1003_v3  ;;  %v1008_v14 = vmax.f32 %v496_v11, 0.0  ;;  %v1009_v15 = vmax.f32 %v497_v12, 0.0  ;;  %v498_v16 = vld [vmem:[%s2054_s30 + $0xb40] sm:$0xff]  ;;  %v499_v17 = vld [vmem:[%s2054_s30 + $0xb48] sm:$0xff] }
  0xec   : > { %v500_v18 = vld [vmem:[%s2054_s30 + $0xb50] sm:$0xff]  ;;  %1516 = vst [vmem:[%s2069_s17 + $0xb10] sm:$0xff] %v1004_v7  ;;  %1517 = vst [vmem:[%s2069_s17 + $0xb18] sm:$0xff] %v1005_v8  ;;  %v1010_v19 = vmax.f32 %v498_v16, 0.0  ;;  %v1011_v20 = vmax.f32 %v499_v17, 0.0  ;;  %v501_v22 = vld [vmem:[%s2054_s30 + $0xb58] sm:$0xff] }
  0xed   : > { %1518 = vst [vmem:[%s2069_s17 + $0xb20] sm:$0xff] %v1006_v9  ;;  %v1012_v21 = vmax.f32 %v500_v18, 0.0  ;;  %v502_v23 = vld [vmem:[%s2054_s30 + $0xb60] sm:$0xff]  ;;  %v503_v24 = vld [vmem:[%s2054_s30 + $0xb68] sm:$0xff]  ;;  %1519 = vst [vmem:[%s2069_s17 + $0xb28] sm:$0xff] %v1007_v13  ;;  %v1013_v25 = vmax.f32 %v501_v22, 0.0 }
  0xee   : > { %1520 = vst [vmem:[%s2069_s17 + $0xb30] sm:$0xff] %v1008_v14  ;;  %1521 = vst [vmem:[%s2069_s17 + $0xb38] sm:$0xff] %v1009_v15  ;;  %v1014_v26 = vmax.f32 %v502_v23, 0.0  ;;  %v1015_v27 = vmax.f32 %v503_v24, 0.0  ;;  %v504_v28 = vld [vmem:[%s2054_s30 + $0xb70] sm:$0xff]  ;;  %v505_v29 = vld [vmem:[%s2054_s30 + $0xb78] sm:$0xff] }
  0xef   : > { %v506_v30 = vld [vmem:[%s2054_s30 + $0xb80] sm:$0xff]  ;;  %1522 = vst [vmem:[%s2069_s17 + $0xb40] sm:$0xff] %v1010_v19  ;;  %1523 = vst [vmem:[%s2069_s17 + $0xb48] sm:$0xff] %v1011_v20  ;;  %v1016_v31 = vmax.f32 %v504_v28, 0.0  ;;  %v1017_v32 = vmax.f32 %v505_v29, 0.0  ;;  %v507_v34 = vld [vmem:[%s2054_s30 + $0xb88] sm:$0xff] }
  0xf0   : > { %1524 = vst [vmem:[%s2069_s17 + $0xb50] sm:$0xff] %v1012_v21  ;;  %v1018_v33 = vmax.f32 %v506_v30, 0.0  ;;  %v508_v35 = vld [vmem:[%s2054_s30 + $0xb90] sm:$0xff]  ;;  %v509_v36 = vld [vmem:[%s2054_s30 + $0xb98] sm:$0xff]  ;;  %1525 = vst [vmem:[%s2069_s17 + $0xb58] sm:$0xff] %v1013_v25  ;;  %v1019_v37 = vmax.f32 %v507_v34, 0.0 }
  0xf1   : > { %1526 = vst [vmem:[%s2069_s17 + $0xb60] sm:$0xff] %v1014_v26  ;;  %1527 = vst [vmem:[%s2069_s17 + $0xb68] sm:$0xff] %v1015_v27  ;;  %v1020_v38 = vmax.f32 %v508_v35, 0.0  ;;  %v1021_v39 = vmax.f32 %v509_v36, 0.0  ;;  %v510_v40 = vld [vmem:[%s2054_s30 + $0xba0] sm:$0xff]  ;;  %v511_v41 = vld [vmem:[%s2054_s30 + $0xba8] sm:$0xff] }
  0xf2   : > { %v512_v42 = vld [vmem:[%s2054_s30 + $0xbb0] sm:$0xff]  ;;  %1528 = vst [vmem:[%s2069_s17 + $0xb70] sm:$0xff] %v1016_v31  ;;  %1529 = vst [vmem:[%s2069_s17 + $0xb78] sm:$0xff] %v1017_v32  ;;  %v1022_v43 = vmax.f32 %v510_v40, 0.0  ;;  %v1023_v44 = vmax.f32 %v511_v41, 0.0  ;;  %v513_v46 = vld [vmem:[%s2054_s30 + $0xbb8] sm:$0xff] }
  0xf3   : > { %1530 = vst [vmem:[%s2069_s17 + $0xb80] sm:$0xff] %v1018_v33  ;;  %v1024_v45 = vmax.f32 %v512_v42, 0.0  ;;  %v514_v47 = vld [vmem:[%s2054_s30 + $0xbc0] sm:$0xff]  ;;  %v515_v48 = vld [vmem:[%s2054_s30 + $0xbc8] sm:$0xff]  ;;  %1531 = vst [vmem:[%s2069_s17 + $0xb88] sm:$0xff] %v1019_v37  ;;  %v1025_v49 = vmax.f32 %v513_v46, 0.0 }
  0xf4   : > { %1532 = vst [vmem:[%s2069_s17 + $0xb90] sm:$0xff] %v1020_v38  ;;  %1533 = vst [vmem:[%s2069_s17 + $0xb98] sm:$0xff] %v1021_v39  ;;  %v1026_v50 = vmax.f32 %v514_v47, 0.0  ;;  %v1027_v51 = vmax.f32 %v515_v48, 0.0  ;;  %v516_v52 = vld [vmem:[%s2054_s30 + $0xbd0] sm:$0xff]  ;;  %v517_v53 = vld [vmem:[%s2054_s30 + $0xbd8] sm:$0xff] }
  0xf5   : > { %v518_v54 = vld [vmem:[%s2054_s30 + $0xbe0] sm:$0xff]  ;;  %1534 = vst [vmem:[%s2069_s17 + $0xba0] sm:$0xff] %v1022_v43  ;;  %1535 = vst [vmem:[%s2069_s17 + $0xba8] sm:$0xff] %v1023_v44  ;;  %v1028_v55 = vmax.f32 %v516_v52, 0.0  ;;  %v1029_v56 = vmax.f32 %v517_v53, 0.0  ;;  %v519_v58 = vld [vmem:[%s2054_s30 + $0xbe8] sm:$0xff] }
  0xf6   : > { %1536 = vst [vmem:[%s2069_s17 + $0xbb0] sm:$0xff] %v1024_v45  ;;  %v1030_v57 = vmax.f32 %v518_v54, 0.0  ;;  %v520_v59 = vld [vmem:[%s2054_s30 + $0xbf0] sm:$0xff]  ;;  %v521_v60 = vld [vmem:[%s2054_s30 + $0xbf8] sm:$0xff]  ;;  %1537 = vst [vmem:[%s2069_s17 + $0xbb8] sm:$0xff] %v1025_v49  ;;  %v1031_v61 = vmax.f32 %v519_v58, 0.0 }
  0xf7   : > { %1538 = vst [vmem:[%s2069_s17 + $0xbc0] sm:$0xff] %v1026_v50  ;;  %1539 = vst [vmem:[%s2069_s17 + $0xbc8] sm:$0xff] %v1027_v51  ;;  %v1032_v62 = vmax.f32 %v520_v59, 0.0  ;;  %v1033_v63 = vmax.f32 %v521_v60, 0.0  ;;  %v522_v0 = vld [vmem:[%s2054_s30 + $0xc00] sm:$0xff]  ;;  %v523_v1 = vld [vmem:[%s2054_s30 + $0xc08] sm:$0xff] }
  0xf8   : > { %v524_v2 = vld [vmem:[%s2054_s30 + $0xc10] sm:$0xff]  ;;  %1540 = vst [vmem:[%s2069_s17 + $0xbd0] sm:$0xff] %v1028_v55  ;;  %1541 = vst [vmem:[%s2069_s17 + $0xbd8] sm:$0xff] %v1029_v56  ;;  %v1034_v3 = vmax.f32 %v522_v0, 0.0  ;;  %v1035_v4 = vmax.f32 %v523_v1, 0.0  ;;  %v525_v6 = vld [vmem:[%s2054_s30 + $0xc18] sm:$0xff] }
  0xf9   : > { %1542 = vst [vmem:[%s2069_s17 + $0xbe0] sm:$0xff] %v1030_v57  ;;  %v1036_v5 = vmax.f32 %v524_v2, 0.0  ;;  %v526_v7 = vld [vmem:[%s2054_s30 + $0xc20] sm:$0xff]  ;;  %v527_v8 = vld [vmem:[%s2054_s30 + $0xc28] sm:$0xff]  ;;  %1543 = vst [vmem:[%s2069_s17 + $0xbe8] sm:$0xff] %v1031_v61  ;;  %v1037_v9 = vmax.f32 %v525_v6, 0.0 }
  0xfa   : > { %1544 = vst [vmem:[%s2069_s17 + $0xbf0] sm:$0xff] %v1032_v62  ;;  %1545 = vst [vmem:[%s2069_s17 + $0xbf8] sm:$0xff] %v1033_v63  ;;  %v1038_v10 = vmax.f32 %v526_v7, 0.0  ;;  %v1039_v11 = vmax.f32 %v527_v8, 0.0  ;;  %v528_v12 = vld [vmem:[%s2054_s30 + $0xc30] sm:$0xff]  ;;  %v529_v13 = vld [vmem:[%s2054_s30 + $0xc38] sm:$0xff] }
  0xfb   : > { %v530_v14 = vld [vmem:[%s2054_s30 + $0xc40] sm:$0xff]  ;;  %1546 = vst [vmem:[%s2069_s17 + $0xc00] sm:$0xff] %v1034_v3  ;;  %1547 = vst [vmem:[%s2069_s17 + $0xc08] sm:$0xff] %v1035_v4  ;;  %v1040_v15 = vmax.f32 %v528_v12, 0.0  ;;  %v1041_v16 = vmax.f32 %v529_v13, 0.0  ;;  %v531_v18 = vld [vmem:[%s2054_s30 + $0xc48] sm:$0xff] }
  0xfc   : > { %1548 = vst [vmem:[%s2069_s17 + $0xc10] sm:$0xff] %v1036_v5  ;;  %v1042_v17 = vmax.f32 %v530_v14, 0.0  ;;  %v532_v19 = vld [vmem:[%s2054_s30 + $0xc50] sm:$0xff]  ;;  %v533_v20 = vld [vmem:[%s2054_s30 + $0xc58] sm:$0xff]  ;;  %1549 = vst [vmem:[%s2069_s17 + $0xc18] sm:$0xff] %v1037_v9  ;;  %v1043_v21 = vmax.f32 %v531_v18, 0.0 }
  0xfd   : > { %1550 = vst [vmem:[%s2069_s17 + $0xc20] sm:$0xff] %v1038_v10  ;;  %1551 = vst [vmem:[%s2069_s17 + $0xc28] sm:$0xff] %v1039_v11  ;;  %v1044_v22 = vmax.f32 %v532_v19, 0.0  ;;  %v1045_v23 = vmax.f32 %v533_v20, 0.0  ;;  %v534_v24 = vld [vmem:[%s2054_s30 + $0xc60] sm:$0xff]  ;;  %v535_v25 = vld [vmem:[%s2054_s30 + $0xc68] sm:$0xff] }
  0xfe   : > { %v536_v26 = vld [vmem:[%s2054_s30 + $0xc70] sm:$0xff]  ;;  %1552 = vst [vmem:[%s2069_s17 + $0xc30] sm:$0xff] %v1040_v15  ;;  %1553 = vst [vmem:[%s2069_s17 + $0xc38] sm:$0xff] %v1041_v16  ;;  %v1046_v27 = vmax.f32 %v534_v24, 0.0  ;;  %v1047_v28 = vmax.f32 %v535_v25, 0.0  ;;  %v537_v30 = vld [vmem:[%s2054_s30 + $0xc78] sm:$0xff] }
  0xff   : > { %1554 = vst [vmem:[%s2069_s17 + $0xc40] sm:$0xff] %v1042_v17  ;;  %v1048_v29 = vmax.f32 %v536_v26, 0.0  ;;  %v538_v31 = vld [vmem:[%s2054_s30 + $0xc80] sm:$0xff]  ;;  %v539_v32 = vld [vmem:[%s2054_s30 + $0xc88] sm:$0xff]  ;;  %1555 = vst [vmem:[%s2069_s17 + $0xc48] sm:$0xff] %v1043_v21  ;;  %v1049_v33 = vmax.f32 %v537_v30, 0.0 }
 0x100   : > { %1556 = vst [vmem:[%s2069_s17 + $0xc50] sm:$0xff] %v1044_v22  ;;  %1557 = vst [vmem:[%s2069_s17 + $0xc58] sm:$0xff] %v1045_v23  ;;  %v1050_v34 = vmax.f32 %v538_v31, 0.0  ;;  %v1051_v35 = vmax.f32 %v539_v32, 0.0  ;;  %v540_v36 = vld [vmem:[%s2054_s30 + $0xc90] sm:$0xff]  ;;  %v541_v37 = vld [vmem:[%s2054_s30 + $0xc98] sm:$0xff] }
 0x101   : > { %v542_v38 = vld [vmem:[%s2054_s30 + $0xca0] sm:$0xff]  ;;  %1558 = vst [vmem:[%s2069_s17 + $0xc60] sm:$0xff] %v1046_v27  ;;  %1559 = vst [vmem:[%s2069_s17 + $0xc68] sm:$0xff] %v1047_v28  ;;  %v1052_v39 = vmax.f32 %v540_v36, 0.0  ;;  %v1053_v40 = vmax.f32 %v541_v37, 0.0  ;;  %v543_v42 = vld [vmem:[%s2054_s30 + $0xca8] sm:$0xff] }
 0x102   : > { %1560 = vst [vmem:[%s2069_s17 + $0xc70] sm:$0xff] %v1048_v29  ;;  %v1054_v41 = vmax.f32 %v542_v38, 0.0  ;;  %v544_v43 = vld [vmem:[%s2054_s30 + $0xcb0] sm:$0xff]  ;;  %v545_v44 = vld [vmem:[%s2054_s30 + $0xcb8] sm:$0xff]  ;;  %1561 = vst [vmem:[%s2069_s17 + $0xc78] sm:$0xff] %v1049_v33  ;;  %v1055_v45 = vmax.f32 %v543_v42, 0.0 }
 0x103   : > { %1562 = vst [vmem:[%s2069_s17 + $0xc80] sm:$0xff] %v1050_v34  ;;  %1563 = vst [vmem:[%s2069_s17 + $0xc88] sm:$0xff] %v1051_v35  ;;  %v1056_v46 = vmax.f32 %v544_v43, 0.0  ;;  %v1057_v47 = vmax.f32 %v545_v44, 0.0  ;;  %v546_v48 = vld [vmem:[%s2054_s30 + $0xcc0] sm:$0xff]  ;;  %v547_v49 = vld [vmem:[%s2054_s30 + $0xcc8] sm:$0xff] }
 0x104   : > { %v548_v50 = vld [vmem:[%s2054_s30 + $0xcd0] sm:$0xff]  ;;  %1564 = vst [vmem:[%s2069_s17 + $0xc90] sm:$0xff] %v1052_v39  ;;  %1565 = vst [vmem:[%s2069_s17 + $0xc98] sm:$0xff] %v1053_v40  ;;  %v1058_v51 = vmax.f32 %v546_v48, 0.0  ;;  %v1059_v52 = vmax.f32 %v547_v49, 0.0  ;;  %v549_v54 = vld [vmem:[%s2054_s30 + $0xcd8] sm:$0xff] }
 0x105   : > { %1566 = vst [vmem:[%s2069_s17 + $0xca0] sm:$0xff] %v1054_v41  ;;  %v1060_v53 = vmax.f32 %v548_v50, 0.0  ;;  %v550_v55 = vld [vmem:[%s2054_s30 + $0xce0] sm:$0xff]  ;;  %v551_v56 = vld [vmem:[%s2054_s30 + $0xce8] sm:$0xff]  ;;  %1567 = vst [vmem:[%s2069_s17 + $0xca8] sm:$0xff] %v1055_v45  ;;  %v1061_v57 = vmax.f32 %v549_v54, 0.0 }
 0x106   : > { %1568 = vst [vmem:[%s2069_s17 + $0xcb0] sm:$0xff] %v1056_v46  ;;  %1569 = vst [vmem:[%s2069_s17 + $0xcb8] sm:$0xff] %v1057_v47  ;;  %v1062_v58 = vmax.f32 %v550_v55, 0.0  ;;  %v1063_v59 = vmax.f32 %v551_v56, 0.0  ;;  %v552_v60 = vld [vmem:[%s2054_s30 + $0xcf0] sm:$0xff]  ;;  %v553_v61 = vld [vmem:[%s2054_s30 + $0xcf8] sm:$0xff] }
 0x107   : > { %v554_v62 = vld [vmem:[%s2054_s30 + $0xd00] sm:$0xff]  ;;  %1570 = vst [vmem:[%s2069_s17 + $0xcc0] sm:$0xff] %v1058_v51  ;;  %1571 = vst [vmem:[%s2069_s17 + $0xcc8] sm:$0xff] %v1059_v52  ;;  %v1064_v63 = vmax.f32 %v552_v60, 0.0  ;;  %v1065_v0 = vmax.f32 %v553_v61, 0.0  ;;  %v555_v2 = vld [vmem:[%s2054_s30 + $0xd08] sm:$0xff] }
 0x108   : > { %1572 = vst [vmem:[%s2069_s17 + $0xcd0] sm:$0xff] %v1060_v53  ;;  %v1066_v1 = vmax.f32 %v554_v62, 0.0  ;;  %v556_v3 = vld [vmem:[%s2054_s30 + $0xd10] sm:$0xff]  ;;  %v557_v4 = vld [vmem:[%s2054_s30 + $0xd18] sm:$0xff]  ;;  %1573 = vst [vmem:[%s2069_s17 + $0xcd8] sm:$0xff] %v1061_v57  ;;  %v1067_v5 = vmax.f32 %v555_v2, 0.0 }
 0x109   : > { %1574 = vst [vmem:[%s2069_s17 + $0xce0] sm:$0xff] %v1062_v58  ;;  %1575 = vst [vmem:[%s2069_s17 + $0xce8] sm:$0xff] %v1063_v59  ;;  %v1068_v6 = vmax.f32 %v556_v3, 0.0  ;;  %v1069_v7 = vmax.f32 %v557_v4, 0.0  ;;  %v558_v8 = vld [vmem:[%s2054_s30 + $0xd20] sm:$0xff]  ;;  %v559_v9 = vld [vmem:[%s2054_s30 + $0xd28] sm:$0xff] }
 0x10a   : > { %v560_v10 = vld [vmem:[%s2054_s30 + $0xd30] sm:$0xff]  ;;  %1576 = vst [vmem:[%s2069_s17 + $0xcf0] sm:$0xff] %v1064_v63  ;;  %1577 = vst [vmem:[%s2069_s17 + $0xcf8] sm:$0xff] %v1065_v0  ;;  %v1070_v11 = vmax.f32 %v558_v8, 0.0  ;;  %v1071_v12 = vmax.f32 %v559_v9, 0.0  ;;  %v561_v14 = vld [vmem:[%s2054_s30 + $0xd38] sm:$0xff] }
 0x10b   : > { %1578 = vst [vmem:[%s2069_s17 + $0xd00] sm:$0xff] %v1066_v1  ;;  %v1072_v13 = vmax.f32 %v560_v10, 0.0  ;;  %v562_v15 = vld [vmem:[%s2054_s30 + $0xd40] sm:$0xff]  ;;  %v563_v16 = vld [vmem:[%s2054_s30 + $0xd48] sm:$0xff]  ;;  %1579 = vst [vmem:[%s2069_s17 + $0xd08] sm:$0xff] %v1067_v5  ;;  %v1073_v17 = vmax.f32 %v561_v14, 0.0 }
 0x10c   : > { %1580 = vst [vmem:[%s2069_s17 + $0xd10] sm:$0xff] %v1068_v6  ;;  %1581 = vst [vmem:[%s2069_s17 + $0xd18] sm:$0xff] %v1069_v7  ;;  %v1074_v18 = vmax.f32 %v562_v15, 0.0  ;;  %v1075_v19 = vmax.f32 %v563_v16, 0.0  ;;  %v564_v20 = vld [vmem:[%s2054_s30 + $0xd50] sm:$0xff]  ;;  %v565_v21 = vld [vmem:[%s2054_s30 + $0xd58] sm:$0xff] }
 0x10d   : > { %v566_v22 = vld [vmem:[%s2054_s30 + $0xd60] sm:$0xff]  ;;  %1582 = vst [vmem:[%s2069_s17 + $0xd20] sm:$0xff] %v1070_v11  ;;  %1583 = vst [vmem:[%s2069_s17 + $0xd28] sm:$0xff] %v1071_v12  ;;  %v1076_v23 = vmax.f32 %v564_v20, 0.0  ;;  %v1077_v24 = vmax.f32 %v565_v21, 0.0  ;;  %v567_v26 = vld [vmem:[%s2054_s30 + $0xd68] sm:$0xff] }
 0x10e   : > { %1584 = vst [vmem:[%s2069_s17 + $0xd30] sm:$0xff] %v1072_v13  ;;  %v1078_v25 = vmax.f32 %v566_v22, 0.0  ;;  %v568_v27 = vld [vmem:[%s2054_s30 + $0xd70] sm:$0xff]  ;;  %v569_v28 = vld [vmem:[%s2054_s30 + $0xd78] sm:$0xff]  ;;  %1585 = vst [vmem:[%s2069_s17 + $0xd38] sm:$0xff] %v1073_v17  ;;  %v1079_v29 = vmax.f32 %v567_v26, 0.0 }
 0x10f   : > { %1586 = vst [vmem:[%s2069_s17 + $0xd40] sm:$0xff] %v1074_v18  ;;  %1587 = vst [vmem:[%s2069_s17 + $0xd48] sm:$0xff] %v1075_v19  ;;  %v1080_v30 = vmax.f32 %v568_v27, 0.0  ;;  %v1081_v31 = vmax.f32 %v569_v28, 0.0  ;;  %v570_v32 = vld [vmem:[%s2054_s30 + $0xd80] sm:$0xff]  ;;  %v571_v33 = vld [vmem:[%s2054_s30 + $0xd88] sm:$0xff] }
 0x110   : > { %v572_v34 = vld [vmem:[%s2054_s30 + $0xd90] sm:$0xff]  ;;  %1588 = vst [vmem:[%s2069_s17 + $0xd50] sm:$0xff] %v1076_v23  ;;  %1589 = vst [vmem:[%s2069_s17 + $0xd58] sm:$0xff] %v1077_v24  ;;  %v1082_v35 = vmax.f32 %v570_v32, 0.0  ;;  %v1083_v36 = vmax.f32 %v571_v33, 0.0  ;;  %v573_v38 = vld [vmem:[%s2054_s30 + $0xd98] sm:$0xff] }
 0x111   : > { %1590 = vst [vmem:[%s2069_s17 + $0xd60] sm:$0xff] %v1078_v25  ;;  %v1084_v37 = vmax.f32 %v572_v34, 0.0  ;;  %v574_v39 = vld [vmem:[%s2054_s30 + $0xda0] sm:$0xff]  ;;  %v575_v40 = vld [vmem:[%s2054_s30 + $0xda8] sm:$0xff]  ;;  %1591 = vst [vmem:[%s2069_s17 + $0xd68] sm:$0xff] %v1079_v29  ;;  %v1085_v41 = vmax.f32 %v573_v38, 0.0 }
 0x112   : > { %1592 = vst [vmem:[%s2069_s17 + $0xd70] sm:$0xff] %v1080_v30  ;;  %1593 = vst [vmem:[%s2069_s17 + $0xd78] sm:$0xff] %v1081_v31  ;;  %v1086_v42 = vmax.f32 %v574_v39, 0.0  ;;  %v1087_v43 = vmax.f32 %v575_v40, 0.0  ;;  %v576_v44 = vld [vmem:[%s2054_s30 + $0xdb0] sm:$0xff]  ;;  %v577_v45 = vld [vmem:[%s2054_s30 + $0xdb8] sm:$0xff] }
 0x113   : > { %v578_v46 = vld [vmem:[%s2054_s30 + $0xdc0] sm:$0xff]  ;;  %1594 = vst [vmem:[%s2069_s17 + $0xd80] sm:$0xff] %v1082_v35  ;;  %1595 = vst [vmem:[%s2069_s17 + $0xd88] sm:$0xff] %v1083_v36  ;;  %v1088_v47 = vmax.f32 %v576_v44, 0.0  ;;  %v1089_v48 = vmax.f32 %v577_v45, 0.0  ;;  %v579_v50 = vld [vmem:[%s2054_s30 + $0xdc8] sm:$0xff] }
 0x114   : > { %1596 = vst [vmem:[%s2069_s17 + $0xd90] sm:$0xff] %v1084_v37  ;;  %v1090_v49 = vmax.f32 %v578_v46, 0.0  ;;  %v580_v51 = vld [vmem:[%s2054_s30 + $0xdd0] sm:$0xff]  ;;  %v581_v52 = vld [vmem:[%s2054_s30 + $0xdd8] sm:$0xff]  ;;  %1597 = vst [vmem:[%s2069_s17 + $0xd98] sm:$0xff] %v1085_v41  ;;  %v1091_v53 = vmax.f32 %v579_v50, 0.0 }
 0x115   : > { %1598 = vst [vmem:[%s2069_s17 + $0xda0] sm:$0xff] %v1086_v42  ;;  %1599 = vst [vmem:[%s2069_s17 + $0xda8] sm:$0xff] %v1087_v43  ;;  %v1092_v54 = vmax.f32 %v580_v51, 0.0  ;;  %v1093_v55 = vmax.f32 %v581_v52, 0.0  ;;  %v582_v56 = vld [vmem:[%s2054_s30 + $0xde0] sm:$0xff]  ;;  %v583_v57 = vld [vmem:[%s2054_s30 + $0xde8] sm:$0xff] }
 0x116   : > { %v584_v58 = vld [vmem:[%s2054_s30 + $0xdf0] sm:$0xff]  ;;  %1600 = vst [vmem:[%s2069_s17 + $0xdb0] sm:$0xff] %v1088_v47  ;;  %1601 = vst [vmem:[%s2069_s17 + $0xdb8] sm:$0xff] %v1089_v48  ;;  %v1094_v59 = vmax.f32 %v582_v56, 0.0  ;;  %v1095_v60 = vmax.f32 %v583_v57, 0.0  ;;  %v585_v62 = vld [vmem:[%s2054_s30 + $0xdf8] sm:$0xff] }
 0x117   : > { %1602 = vst [vmem:[%s2069_s17 + $0xdc0] sm:$0xff] %v1090_v49  ;;  %v1096_v61 = vmax.f32 %v584_v58, 0.0  ;;  %v586_v63 = vld [vmem:[%s2054_s30 + $0xe00] sm:$0xff]  ;;  %v587_v0 = vld [vmem:[%s2054_s30 + $0xe08] sm:$0xff]  ;;  %1603 = vst [vmem:[%s2069_s17 + $0xdc8] sm:$0xff] %v1091_v53  ;;  %v1097_v1 = vmax.f32 %v585_v62, 0.0 }
 0x118   : > { %1604 = vst [vmem:[%s2069_s17 + $0xdd0] sm:$0xff] %v1092_v54  ;;  %1605 = vst [vmem:[%s2069_s17 + $0xdd8] sm:$0xff] %v1093_v55  ;;  %v1098_v2 = vmax.f32 %v586_v63, 0.0  ;;  %v1099_v3 = vmax.f32 %v587_v0, 0.0  ;;  %v588_v4 = vld [vmem:[%s2054_s30 + $0xe10] sm:$0xff]  ;;  %v589_v5 = vld [vmem:[%s2054_s30 + $0xe18] sm:$0xff] }
 0x119   : > { %v590_v6 = vld [vmem:[%s2054_s30 + $0xe20] sm:$0xff]  ;;  %1606 = vst [vmem:[%s2069_s17 + $0xde0] sm:$0xff] %v1094_v59  ;;  %1607 = vst [vmem:[%s2069_s17 + $0xde8] sm:$0xff] %v1095_v60  ;;  %v1100_v7 = vmax.f32 %v588_v4, 0.0  ;;  %v1101_v8 = vmax.f32 %v589_v5, 0.0  ;;  %v591_v10 = vld [vmem:[%s2054_s30 + $0xe28] sm:$0xff] }
 0x11a   : > { %1608 = vst [vmem:[%s2069_s17 + $0xdf0] sm:$0xff] %v1096_v61  ;;  %v1102_v9 = vmax.f32 %v590_v6, 0.0  ;;  %v592_v11 = vld [vmem:[%s2054_s30 + $0xe30] sm:$0xff]  ;;  %v593_v12 = vld [vmem:[%s2054_s30 + $0xe38] sm:$0xff]  ;;  %1609 = vst [vmem:[%s2069_s17 + $0xdf8] sm:$0xff] %v1097_v1  ;;  %v1103_v13 = vmax.f32 %v591_v10, 0.0 }
 0x11b   : > { %1610 = vst [vmem:[%s2069_s17 + $0xe00] sm:$0xff] %v1098_v2  ;;  %1611 = vst [vmem:[%s2069_s17 + $0xe08] sm:$0xff] %v1099_v3  ;;  %v1104_v14 = vmax.f32 %v592_v11, 0.0  ;;  %v1105_v15 = vmax.f32 %v593_v12, 0.0  ;;  %v594_v16 = vld [vmem:[%s2054_s30 + $0xe40] sm:$0xff]  ;;  %v595_v17 = vld [vmem:[%s2054_s30 + $0xe48] sm:$0xff] }
 0x11c   : > { %v596_v18 = vld [vmem:[%s2054_s30 + $0xe50] sm:$0xff]  ;;  %1612 = vst [vmem:[%s2069_s17 + $0xe10] sm:$0xff] %v1100_v7  ;;  %1613 = vst [vmem:[%s2069_s17 + $0xe18] sm:$0xff] %v1101_v8  ;;  %v1106_v19 = vmax.f32 %v594_v16, 0.0  ;;  %v1107_v20 = vmax.f32 %v595_v17, 0.0  ;;  %v597_v22 = vld [vmem:[%s2054_s30 + $0xe58] sm:$0xff] }
 0x11d   : > { %1614 = vst [vmem:[%s2069_s17 + $0xe20] sm:$0xff] %v1102_v9  ;;  %v1108_v21 = vmax.f32 %v596_v18, 0.0  ;;  %v598_v23 = vld [vmem:[%s2054_s30 + $0xe60] sm:$0xff]  ;;  %v599_v24 = vld [vmem:[%s2054_s30 + $0xe68] sm:$0xff]  ;;  %1615 = vst [vmem:[%s2069_s17 + $0xe28] sm:$0xff] %v1103_v13  ;;  %v1109_v25 = vmax.f32 %v597_v22, 0.0 }
 0x11e   : > { %1616 = vst [vmem:[%s2069_s17 + $0xe30] sm:$0xff] %v1104_v14  ;;  %1617 = vst [vmem:[%s2069_s17 + $0xe38] sm:$0xff] %v1105_v15  ;;  %v1110_v26 = vmax.f32 %v598_v23, 0.0  ;;  %v1111_v27 = vmax.f32 %v599_v24, 0.0  ;;  %v600_v28 = vld [vmem:[%s2054_s30 + $0xe70] sm:$0xff]  ;;  %v601_v29 = vld [vmem:[%s2054_s30 + $0xe78] sm:$0xff] }
 0x11f   : > { %v602_v30 = vld [vmem:[%s2054_s30 + $0xe80] sm:$0xff]  ;;  %1618 = vst [vmem:[%s2069_s17 + $0xe40] sm:$0xff] %v1106_v19  ;;  %1619 = vst [vmem:[%s2069_s17 + $0xe48] sm:$0xff] %v1107_v20  ;;  %v1112_v31 = vmax.f32 %v600_v28, 0.0  ;;  %v1113_v32 = vmax.f32 %v601_v29, 0.0  ;;  %v603_v34 = vld [vmem:[%s2054_s30 + $0xe88] sm:$0xff] }
 0x120   : > { %1620 = vst [vmem:[%s2069_s17 + $0xe50] sm:$0xff] %v1108_v21  ;;  %v1114_v33 = vmax.f32 %v602_v30, 0.0  ;;  %v604_v35 = vld [vmem:[%s2054_s30 + $0xe90] sm:$0xff]  ;;  %v605_v36 = vld [vmem:[%s2054_s30 + $0xe98] sm:$0xff]  ;;  %1621 = vst [vmem:[%s2069_s17 + $0xe58] sm:$0xff] %v1109_v25  ;;  %v1115_v37 = vmax.f32 %v603_v34, 0.0 }
 0x121   : > { %1622 = vst [vmem:[%s2069_s17 + $0xe60] sm:$0xff] %v1110_v26  ;;  %1623 = vst [vmem:[%s2069_s17 + $0xe68] sm:$0xff] %v1111_v27  ;;  %v1116_v38 = vmax.f32 %v604_v35, 0.0  ;;  %v1117_v39 = vmax.f32 %v605_v36, 0.0  ;;  %v606_v40 = vld [vmem:[%s2054_s30 + $0xea0] sm:$0xff]  ;;  %v607_v41 = vld [vmem:[%s2054_s30 + $0xea8] sm:$0xff] }
 0x122   : > { %v608_v42 = vld [vmem:[%s2054_s30 + $0xeb0] sm:$0xff]  ;;  %1624 = vst [vmem:[%s2069_s17 + $0xe70] sm:$0xff] %v1112_v31  ;;  %1625 = vst [vmem:[%s2069_s17 + $0xe78] sm:$0xff] %v1113_v32  ;;  %v1118_v43 = vmax.f32 %v606_v40, 0.0  ;;  %v1119_v44 = vmax.f32 %v607_v41, 0.0  ;;  %v609_v46 = vld [vmem:[%s2054_s30 + $0xeb8] sm:$0xff] }
 0x123   : > { %1626 = vst [vmem:[%s2069_s17 + $0xe80] sm:$0xff] %v1114_v33  ;;  %v1120_v45 = vmax.f32 %v608_v42, 0.0  ;;  %v610_v47 = vld [vmem:[%s2054_s30 + $0xec0] sm:$0xff]  ;;  %v611_v48 = vld [vmem:[%s2054_s30 + $0xec8] sm:$0xff]  ;;  %1627 = vst [vmem:[%s2069_s17 + $0xe88] sm:$0xff] %v1115_v37  ;;  %v1121_v49 = vmax.f32 %v609_v46, 0.0 }
 0x124   : > { %1628 = vst [vmem:[%s2069_s17 + $0xe90] sm:$0xff] %v1116_v38  ;;  %1629 = vst [vmem:[%s2069_s17 + $0xe98] sm:$0xff] %v1117_v39  ;;  %v1122_v50 = vmax.f32 %v610_v47, 0.0  ;;  %v1123_v51 = vmax.f32 %v611_v48, 0.0  ;;  %v612_v52 = vld [vmem:[%s2054_s30 + $0xed0] sm:$0xff]  ;;  %v613_v53 = vld [vmem:[%s2054_s30 + $0xed8] sm:$0xff] }
 0x125   : > { %v614_v54 = vld [vmem:[%s2054_s30 + $0xee0] sm:$0xff]  ;;  %1630 = vst [vmem:[%s2069_s17 + $0xea0] sm:$0xff] %v1118_v43  ;;  %1631 = vst [vmem:[%s2069_s17 + $0xea8] sm:$0xff] %v1119_v44  ;;  %v1124_v55 = vmax.f32 %v612_v52, 0.0  ;;  %v1125_v56 = vmax.f32 %v613_v53, 0.0  ;;  %v615_v58 = vld [vmem:[%s2054_s30 + $0xee8] sm:$0xff] }
 0x126   : > { %1632 = vst [vmem:[%s2069_s17 + $0xeb0] sm:$0xff] %v1120_v45  ;;  %v1126_v57 = vmax.f32 %v614_v54, 0.0  ;;  %v616_v59 = vld [vmem:[%s2054_s30 + $0xef0] sm:$0xff]  ;;  %v617_v60 = vld [vmem:[%s2054_s30 + $0xef8] sm:$0xff]  ;;  %1633 = vst [vmem:[%s2069_s17 + $0xeb8] sm:$0xff] %v1121_v49  ;;  %v1127_v61 = vmax.f32 %v615_v58, 0.0 }
 0x127   : > { %1634 = vst [vmem:[%s2069_s17 + $0xec0] sm:$0xff] %v1122_v50  ;;  %1635 = vst [vmem:[%s2069_s17 + $0xec8] sm:$0xff] %v1123_v51  ;;  %v1128_v62 = vmax.f32 %v616_v59, 0.0  ;;  %v1129_v63 = vmax.f32 %v617_v60, 0.0  ;;  %v618_v0 = vld [vmem:[%s2054_s30 + $0xf00] sm:$0xff]  ;;  %v619_v1 = vld [vmem:[%s2054_s30 + $0xf08] sm:$0xff] }
 0x128   : > { %v620_v2 = vld [vmem:[%s2054_s30 + $0xf10] sm:$0xff]  ;;  %1636 = vst [vmem:[%s2069_s17 + $0xed0] sm:$0xff] %v1124_v55  ;;  %1637 = vst [vmem:[%s2069_s17 + $0xed8] sm:$0xff] %v1125_v56  ;;  %v1130_v3 = vmax.f32 %v618_v0, 0.0  ;;  %v1131_v4 = vmax.f32 %v619_v1, 0.0  ;;  %v621_v6 = vld [vmem:[%s2054_s30 + $0xf18] sm:$0xff] }
 0x129   : > { %1638 = vst [vmem:[%s2069_s17 + $0xee0] sm:$0xff] %v1126_v57  ;;  %v1132_v5 = vmax.f32 %v620_v2, 0.0  ;;  %v622_v7 = vld [vmem:[%s2054_s30 + $0xf20] sm:$0xff]  ;;  %v623_v8 = vld [vmem:[%s2054_s30 + $0xf28] sm:$0xff]  ;;  %1639 = vst [vmem:[%s2069_s17 + $0xee8] sm:$0xff] %v1127_v61  ;;  %v1133_v9 = vmax.f32 %v621_v6, 0.0 }
 0x12a   : > { %1640 = vst [vmem:[%s2069_s17 + $0xef0] sm:$0xff] %v1128_v62  ;;  %1641 = vst [vmem:[%s2069_s17 + $0xef8] sm:$0xff] %v1129_v63  ;;  %v1134_v10 = vmax.f32 %v622_v7, 0.0  ;;  %v1135_v11 = vmax.f32 %v623_v8, 0.0  ;;  %v624_v12 = vld [vmem:[%s2054_s30 + $0xf30] sm:$0xff]  ;;  %v625_v13 = vld [vmem:[%s2054_s30 + $0xf38] sm:$0xff] }
 0x12b   : > { %v626_v14 = vld [vmem:[%s2054_s30 + $0xf40] sm:$0xff]  ;;  %1642 = vst [vmem:[%s2069_s17 + $0xf00] sm:$0xff] %v1130_v3  ;;  %1643 = vst [vmem:[%s2069_s17 + $0xf08] sm:$0xff] %v1131_v4  ;;  %v1136_v15 = vmax.f32 %v624_v12, 0.0  ;;  %v1137_v16 = vmax.f32 %v625_v13, 0.0  ;;  %v627_v18 = vld [vmem:[%s2054_s30 + $0xf48] sm:$0xff] }
 0x12c   : > { %1644 = vst [vmem:[%s2069_s17 + $0xf10] sm:$0xff] %v1132_v5  ;;  %v1138_v17 = vmax.f32 %v626_v14, 0.0  ;;  %v628_v19 = vld [vmem:[%s2054_s30 + $0xf50] sm:$0xff]  ;;  %v629_v20 = vld [vmem:[%s2054_s30 + $0xf58] sm:$0xff]  ;;  %1645 = vst [vmem:[%s2069_s17 + $0xf18] sm:$0xff] %v1133_v9  ;;  %v1139_v21 = vmax.f32 %v627_v18, 0.0 }
 0x12d   : > { %1646 = vst [vmem:[%s2069_s17 + $0xf20] sm:$0xff] %v1134_v10  ;;  %1647 = vst [vmem:[%s2069_s17 + $0xf28] sm:$0xff] %v1135_v11  ;;  %v1140_v22 = vmax.f32 %v628_v19, 0.0  ;;  %v1141_v23 = vmax.f32 %v629_v20, 0.0  ;;  %v630_v24 = vld [vmem:[%s2054_s30 + $0xf60] sm:$0xff]  ;;  %v631_v25 = vld [vmem:[%s2054_s30 + $0xf68] sm:$0xff] }
 0x12e   : > { %v632_v26 = vld [vmem:[%s2054_s30 + $0xf70] sm:$0xff]  ;;  %1648 = vst [vmem:[%s2069_s17 + $0xf30] sm:$0xff] %v1136_v15  ;;  %1649 = vst [vmem:[%s2069_s17 + $0xf38] sm:$0xff] %v1137_v16  ;;  %v1142_v27 = vmax.f32 %v630_v24, 0.0  ;;  %v1143_v28 = vmax.f32 %v631_v25, 0.0  ;;  %v633_v30 = vld [vmem:[%s2054_s30 + $0xf78] sm:$0xff] }
 0x12f   : > { %1650 = vst [vmem:[%s2069_s17 + $0xf40] sm:$0xff] %v1138_v17  ;;  %v1144_v29 = vmax.f32 %v632_v26, 0.0  ;;  %v634_v31 = vld [vmem:[%s2054_s30 + $0xf80] sm:$0xff]  ;;  %v635_v32 = vld [vmem:[%s2054_s30 + $0xf88] sm:$0xff]  ;;  %1651 = vst [vmem:[%s2069_s17 + $0xf48] sm:$0xff] %v1139_v21  ;;  %v1145_v33 = vmax.f32 %v633_v30, 0.0 }
 0x130   : > { %1652 = vst [vmem:[%s2069_s17 + $0xf50] sm:$0xff] %v1140_v22  ;;  %1653 = vst [vmem:[%s2069_s17 + $0xf58] sm:$0xff] %v1141_v23  ;;  %v1146_v34 = vmax.f32 %v634_v31, 0.0  ;;  %v1147_v35 = vmax.f32 %v635_v32, 0.0  ;;  %v636_v36 = vld [vmem:[%s2054_s30 + $0xf90] sm:$0xff]  ;;  %v637_v37 = vld [vmem:[%s2054_s30 + $0xf98] sm:$0xff] }
 0x131   : > { %v638_v38 = vld [vmem:[%s2054_s30 + $0xfa0] sm:$0xff]  ;;  %1654 = vst [vmem:[%s2069_s17 + $0xf60] sm:$0xff] %v1142_v27  ;;  %1655 = vst [vmem:[%s2069_s17 + $0xf68] sm:$0xff] %v1143_v28  ;;  %v1148_v39 = vmax.f32 %v636_v36, 0.0  ;;  %v1149_v40 = vmax.f32 %v637_v37, 0.0  ;;  %v639_v42 = vld [vmem:[%s2054_s30 + $0xfa8] sm:$0xff] }
 0x132   : > { %1656 = vst [vmem:[%s2069_s17 + $0xf70] sm:$0xff] %v1144_v29  ;;  %v1150_v41 = vmax.f32 %v638_v38, 0.0  ;;  %v640_v43 = vld [vmem:[%s2054_s30 + $0xfb0] sm:$0xff]  ;;  %v641_v44 = vld [vmem:[%s2054_s30 + $0xfb8] sm:$0xff]  ;;  %1657 = vst [vmem:[%s2069_s17 + $0xf78] sm:$0xff] %v1145_v33  ;;  %v1151_v45 = vmax.f32 %v639_v42, 0.0 }
 0x133   : > { %1658 = vst [vmem:[%s2069_s17 + $0xf80] sm:$0xff] %v1146_v34  ;;  %1659 = vst [vmem:[%s2069_s17 + $0xf88] sm:$0xff] %v1147_v35  ;;  %v1152_v46 = vmax.f32 %v640_v43, 0.0  ;;  %v1153_v47 = vmax.f32 %v641_v44, 0.0  ;;  %v642_v48 = vld [vmem:[%s2054_s30 + $0xfc0] sm:$0xff]  ;;  %v643_v49 = vld [vmem:[%s2054_s30 + $0xfc8] sm:$0xff] }
 0x134   : > { %v644_v50 = vld [vmem:[%s2054_s30 + $0xfd0] sm:$0xff]  ;;  %1660 = vst [vmem:[%s2069_s17 + $0xf90] sm:$0xff] %v1148_v39  ;;  %1661 = vst [vmem:[%s2069_s17 + $0xf98] sm:$0xff] %v1149_v40  ;;  %v1154_v51 = vmax.f32 %v642_v48, 0.0  ;;  %v1155_v52 = vmax.f32 %v643_v49, 0.0  ;;  %v645_v54 = vld [vmem:[%s2054_s30 + $0xfd8] sm:$0xff] }
 0x135   : > { %1662 = vst [vmem:[%s2069_s17 + $0xfa0] sm:$0xff] %v1150_v41  ;;  %v1156_v53 = vmax.f32 %v644_v50, 0.0  ;;  %v646_v55 = vld [vmem:[%s2054_s30 + $0xfe0] sm:$0xff]  ;;  %v647_v56 = vld [vmem:[%s2054_s30 + $0xfe8] sm:$0xff]  ;;  %1663 = vst [vmem:[%s2069_s17 + $0xfa8] sm:$0xff] %v1151_v45  ;;  %v1157_v57 = vmax.f32 %v645_v54, 0.0 }
 0x136   : > { %1664 = vst [vmem:[%s2069_s17 + $0xfb0] sm:$0xff] %v1152_v46  ;;  %1665 = vst [vmem:[%s2069_s17 + $0xfb8] sm:$0xff] %v1153_v47  ;;  %v1158_v58 = vmax.f32 %v646_v55, 0.0  ;;  %v1159_v59 = vmax.f32 %v647_v56, 0.0  ;;  %v648_v60 = vld [vmem:[%s2054_s30 + $0xff0] sm:$0xff]  ;;  %v649_v61 = vld [vmem:[%s2054_s30 + $0xff8] sm:$0xff] }
 0x137   : > { %1666 = vst [vmem:[%s2069_s17 + $0xfc0] sm:$0xff] %v1154_v51  ;;  %1667 = vst [vmem:[%s2069_s17 + $0xfc8] sm:$0xff] %v1155_v52  ;;  %v1160_v62 = vmax.f32 %v648_v60, 0.0  ;;  %v1161_v63 = vmax.f32 %v649_v61, 0.0  ;;  %s1675_s3 = scalar_lea.sflag [#allocation4], %s2050_s23  ;;  %s1862_s4 = scalar_lea.vmem %s3091_s27, 65536 }
 0x138   : > { %1668 = vst [vmem:[%s2069_s17 + $0xfd0] sm:$0xff] %v1156_v53  ;;  %1669 = vst [vmem:[%s2069_s17 + $0xfd8] sm:$0xff] %v1157_v57  ;;  %p1863_p6 = scmp.ne.s32.totalorder %s3091_s27, %s1862_s4  ;;  %p3145_p11 = scmp.ne.s32.totalorder %s3142_s18, 0 }
 0x139   : > { %1670 = vst [vmem:[%s2069_s17 + $0xfe0] sm:$0xff] %v1158_v58  ;;  %1671 = vst [vmem:[%s2069_s17 + $0xfe8] sm:$0xff] %v1159_v59  ;;  %s1933_s10 = smov [#allocation5]  }
 0x13a   : > { %1672 = vst [vmem:[%s2069_s17 + $0xff0] sm:$0xff] %v1160_v62  ;;  %1673 = vst [vmem:[%s2069_s17 + $0xff8] sm:$0xff] %v1161_v63  ;;  %p1864_p12 = pnand %p1863_p6, %p3145_p11  ;;  %s1866_s5 = sshll.u32 %s1933_s10, 4  ;;  %s1867_s5 = int_to_ptr.vmem [resolvable:$false] %s1866_s5 }
 0x13b   : > { %s1868_s11 = scalar_lea.vmem %s1867_s5, 131072  ;;  %p1869_p8 = scmp.lt.s32.totalorder %s3091_s27, %s1867_s5 }
 0x13c   : > { %p1865_p13 = pneg %p1864_p12  ;;  %p1870_p10 = scmp.lt.s32.totalorder %s1868_s11, %s1862_s4 }
 0x13e   : > { %p1871_p0 = por %p1870_p10, %p1869_p8 }
 0x140   : > { %p1872_p2 = pnand %p1871_p0, %p1865_p13 }
 0x142   : > { %1875 = shalt.err (!%p1872_p2)
}
 0x143   : > { %s1876_s13 = scalar_lea.hbm %s3089_s2, 65536  ;;  %s1880_s20 = scalar_lea.hbm %s3138_s1, 131072 }
 0x144   : > { %p1877_p4 = scmp.ne.s32.totalorder %s3089_s2, %s1876_s13  ;;  %p1881_p9 = scmp.lt.u32.totalorder %s3089_s2, %s3138_s1 }
 0x145   : > { %p1882_p1 = scmp.lt.u32.totalorder %s1880_s20, %s1876_s13  ;;  %p1884_p6 = scmp.lt.u32.totalorder %s1876_s13, %s3089_s2 }
 0x146   : > { %p1878_p5 = pnand %p1877_p4, %p3145_p11 }
 0x147   : > { %p1883_p3 = por %p1882_p1, %p1881_p9 }
 0x148   : > { %p1879_p7 = pneg %p1878_p5 }
 0x149   : > { %p1885_p12 = por %p1884_p6, %p1883_p3 }
 0x14b   : > { %p1886_p13 = pnand %p1885_p12, %p1879_p7 }
 0x14d   : > { %1889 = shalt.err (!%p1886_p13)
}
 0x14e   : > { %s1934_s24 = smov 512   ;;  %s1935_s26 = smov 32  }
 0x14f   : > { %1784 = dma.vmem_to_hbm [thread:$0]  (%p3145_p11), %s3091_s27, 65536, %s3089_s2, %s1675_s3, %s1934_s24, %s1934_s24, %s1935_s26  }
 0x150 PF: > { %s1704_s30 = sand.u32 1, %s1916_s6   ;;  %p3146_p8 = scmp.ne.s32.totalorder %s3143_s19, 0 }
 0x151   : > { %p3147_p10 = scmp.ge.s32.totalorder %s1928_s9, 2  ;;  %s1705_s17 = scalar_lea.sflag [#allocation4], %s1704_s30 }
 0x153   : > { %p1791_p0 = pnand %p3147_p10, %p3146_p8 }
 0x155   : > { %1911 = dma.done.wait (!%p1791_p0), %s1705_s17, 65536  }
 0x156   : > { %1913 = vsyncadd (!%p1791_p0), %s1705_s17, 4294901760  ;;  %p14_p2 = scmp.ge.s32.totalorder %s1971_s12, 4   ;;  %s3148_s6 = smov %s1920_s7 }
 0x157   : > { %s3149_s7 = smov %s1924_s8  ;;  %s3150_s8 = smov %s1983_s15 }
 0x158   : > { %s3151_s9 = smov %s1971_s12  ;;  %16 = sbr.rel (!%p14_p2) target bundleno = 5 (0x5), region = 69 }
 0x15f   :  { %1710 = vsyncpa [#allocation3], 1 }
 0x160   :  { %1712 = vsyncpa [#allocation3 + $0x1], 1 }
 0x161   :  { %1713 = vsyncpa [#allocation4], 1 }
 0x162   :  { %1715 = vsyncpa [#allocation4 + $0x1], 1 }

</bundles_post_ra>
